<compile_context>
chip_gen: v7x
topology: tpu7x:2x2x1
jax: 0.10.0
libtpu: 0.0.40
codegen_flags: <defaults>
</compile_context>

<pallas_src>
import jax
import jax.numpy as jnp
from jax import lax
from jax.experimental import pallas as pl
from jax.experimental.pallas import tpu as pltpu


def _make_kernel(N, C_mid, C_out, F, Hp, Wp, Lcin):
    NWp = N * Wp
    inv_cnt = 1.0 / float(N * Hp * Wp)   # elements per channel for BN stats
    eps = 1e-5
    f32 = jnp.float32
    bf16 = jnp.bfloat16

    def kernel(x_ref, cm_ref, wc_ref, wr_ref, scal_ref, out_ref):
        m = pl.program_id(0)              # intermediate (conv-output) channel

        # ---------------- MaxPool2d(2): three vector maxes ------------------
        # x_ref holds the 4 even/odd row/col quadrant slabs, each (Hp, Lcin).
        pooled = jnp.maximum(
            jnp.maximum(x_ref[0, :, :], x_ref[1, :, :]),
            jnp.maximum(x_ref[2, :, :], x_ref[3, :, :]))          # (Hp, Lcin) f32

        # ------- Conv2d 3x3 pad=1 (channel m): 3 accumulated bf16 matmuls ---
        # cm folds the 3x3 weights, the +/-1 column shifts and the Cin
        # reduction; row shifts via XLU roll with the wrapped boundary zeroed.
        ri = lax.broadcasted_iota(jnp.int32, (Hp, Lcin), 0)
        p_prev = jnp.where(ri == 0, 0.0, pltpu.roll(pooled, shift=1, axis=0))
        p_next = jnp.where(ri == Hp - 1, 0.0,
                           pltpu.roll(pooled, shift=Hp - 1, axis=0))
        cm = cm_ref[...]                                          # (3*Lcin, NWp) bf16
        conv = jnp.dot(p_prev.astype(bf16), cm[:Lcin, :],
                       preferred_element_type=f32)
        conv += jnp.dot(pooled.astype(bf16), cm[Lcin:2 * Lcin, :],
                        preferred_element_type=f32)
        conv += jnp.dot(p_next.astype(bf16), cm[2 * Lcin:, :],
                        preferred_element_type=f32)
        conv = conv + scal_ref[m]                                 # conv bias b1[m]

        # ------- BatchNorm2d (batch stats, single channel m) + ReLU ---------
        mean1 = jnp.sum(conv) * inv_cnt
        var1 = jnp.maximum(jnp.sum(conv * conv) * inv_cnt - mean1 * mean1, 0.0)
        a1 = scal_ref[C_mid + m] * lax.rsqrt(var1 + eps)          # gamma1[m]
        b1 = scal_ref[2 * C_mid + m]                              # beta1[m]
        relu1 = jnp.maximum((conv - mean1) * a1 + b1, 0.0)        # (Hp, NWp)

        # ------- BoxConv2d: batched column mix + per-filter row mix ---------
        # TODO(synk): the CUDA box_convolution extension's exact border /
        #             normalization convention (reparametrization_factor) is
        #             approximated by fractional pixel-box overlap matrices.
        u = jnp.dot(relu1.astype(bf16), wc_ref[...],
                    preferred_element_type=f32)                   # (Hp, F*NWp)
        wr = wr_ref[...]                                          # (F*Hp, Hp) f32
        outs = []
        for f in range(F):
            boxed = jnp.dot(wr[f * Hp:(f + 1) * Hp, :],
                            u[:, f * NWp:(f + 1) * NWp],
                            preferred_element_type=f32)           # (Hp, NWp)
            # ---- BatchNorm2d (batch stats, out channel oc) + ReLU ----------
            mean2 = jnp.sum(boxed) * inv_cnt
            var2 = jnp.maximum(jnp.sum(boxed * boxed) * inv_cnt
                               - mean2 * mean2, 0.0)
            oc = m * F + f
            a2 = scal_ref[3 * C_mid + oc] * lax.rsqrt(var2 + eps)  # gamma2[oc]
            b2 = scal_ref[3 * C_mid + C_out + oc]                  # beta2[oc]
            outs.append(jnp.maximum((boxed - mean2) * a2 + b2, 0.0))
        # One lane-dense (Hp, F*NWp) store per grid step (channel-major block).
        out_ref[...] = jnp.concatenate(outs, axis=1)

    return kernel


def _precompute(params, N, C_in, H, W):
    """Host-side, parameter/shape-only constant matrices for the kernel."""
    f32 = jnp.float32
    bf16 = jnp.bfloat16
    C_mid = params["b1"].shape[0]
    F = params["x_min"].shape[1]
    Hp, Wp = H // 2, W // 2
    Lcin = N * C_in * Wp
    NWp = N * Wp

    # --- conv matrix: folds 3x3 weights, column shifts, Cin reduction -------
    # cm[m, ky, (n,c,j), (n',q)] = sum_kx w1[m,c,ky,kx] * [j == q+kx-1] * [n==n']
    w1 = params["w1"].astype(f32)                                 # (Cmid, Cin, 3, 3)
    jj = jnp.arange(Wp)
    shift = (jj[None, :, None] ==
             (jj[None, None, :] + jnp.arange(3)[:, None, None] - 1)).astype(f32)
    eyeN = jnp.eye(N, dtype=f32)
    cm = jnp.einsum("mcyx,xjq,nr->myncjrq", w1, shift, eyeN)
    cm = cm.reshape(C_mid, 3 * Lcin, NWp).astype(bf16)

    # --- box-conv fractional-overlap matrices --------------------------------
    xmn = params["x_min"].astype(f32); xmx = params["x_max"].astype(f32)  # (Cmid, F)
    ymn = params["y_min"].astype(f32); ymx = params["y_max"].astype(f32)
    ii = jnp.arange(Hp, dtype=f32)
    qq = jnp.arange(Wp, dtype=f32)
    # wrow[m,f,i,p]: overlap of pixel row p with box rows [i+xmin, i+xmax]
    wrow = jnp.clip(
        jnp.minimum(ii[None, None, None, :] + 0.5,
                    ii[None, None, :, None] + xmx[:, :, None, None])
        - jnp.maximum(ii[None, None, None, :] - 0.5,
                      ii[None, None, :, None] + xmn[:, :, None, None]),
        0.0, 1.0)                                                 # (Cmid, F, Hp, Hp)
    # wcol[m,f,q,j]: overlap of pixel col j with box cols [q+ymin, q+ymax]
    wcol = jnp.clip(
        jnp.minimum(qq[None, None, None, :] + 0.5,
                    qq[None, None, :, None] + ymx[:, :, None, None])
        - jnp.maximum(qq[None, None, None, :] - 0.5,
                      qq[None, None, :, None] + ymn[:, :, None, None]),
        0.0, 1.0)                                                 # (Cmid, F, Wp, Wp)
    area = jnp.maximum((xmx - xmn) * (ymx - ymn), 1e-6)           # (Cmid, F)
    wr = (wrow / area[:, :, None, None]).reshape(C_mid, F * Hp, Hp).astype(f32)
    # column mix, block-diagonal over batch: wc[m, (n,j), (f,n',q)]
    wc = jnp.einsum("nr,mfqj->mnjfrq", eyeN, wcol)
    wc = wc.reshape(C_mid, NWp, F * NWp).astype(bf16)

    # --- all per-channel scalars in one SMEM vector --------------------------
    scal = jnp.concatenate([params["b1"].astype(f32),
                            params["gamma1"].astype(f32),
                            params["beta1"].astype(f32),
                            params["gamma2"].astype(f32),
                            params["beta2"].astype(f32)])

    return cm, wc, wr, scal


def init_params(key, in_channels, out_channels, max_input_h, max_input_w):
    c_mid = max(in_channels // 4, 1)
    num_filters = out_channels // c_mid
    c_out = c_mid * num_filters
    k = jax.random.split(key, 6)
    w1 = 0.1 * jax.random.normal(k[0], (c_mid, in_channels, 3, 3), jnp.float32)
    b1 = 0.05 * jax.random.normal(k[1], (c_mid,), jnp.float32)
    gamma1 = 1.0 + 0.1 * jnp.arange(c_mid, dtype=jnp.float32)
    beta1 = 0.02 * jnp.arange(c_mid, dtype=jnp.float32)
    x_min = jax.random.uniform(k[2], (c_mid, num_filters), jnp.float32,
                               minval=-0.45 * max_input_h, maxval=-0.6)
    x_max = jax.random.uniform(k[3], (c_mid, num_filters), jnp.float32,
                               minval=0.6, maxval=0.45 * max_input_h)
    y_min = jax.random.uniform(k[4], (c_mid, num_filters), jnp.float32,
                               minval=-0.45 * max_input_w, maxval=-0.6)
    y_max = jax.random.uniform(k[5], (c_mid, num_filters), jnp.float32,
                               minval=0.6, maxval=0.45 * max_input_w)
    gamma2 = 1.0 + 0.05 * jnp.arange(c_out, dtype=jnp.float32)
    beta2 = -0.01 * jnp.arange(c_out, dtype=jnp.float32)
    return dict(w1=w1, b1=b1, gamma1=gamma1, beta1=beta1,
                x_min=x_min, x_max=x_max, y_min=y_min, y_max=y_max,
                gamma2=gamma2, beta2=beta2)


def down_forward(x, params):
    N, C_in, H, W = x.shape
    C_mid = params["b1"].shape[0]
    F = params["x_min"].shape[1]
    C_out = C_mid * F
    Hp, Wp = H // 2, W // 2
    Lcin = N * C_in * Wp
    NWp = N * Wp
    # Lane-density / BlockSpec guard: per-step output block must be 128-dense
    # (or the full array, which is always the case when C_mid == 1).
    assert C_mid == 1 or (F * NWp) % 128 == 0, "pad batch/width for lane density"

    cm, wc, wr, scal = _precompute(params, N, C_in, H, W)

    # Pack NCHW into 4 even/odd row/col quadrant slabs (pure layout; the
    # MaxPool max itself runs inside the kernel).
    xp = x.astype(jnp.float32).reshape(N, C_in, Hp, 2, Wp, 2)
    xp = xp.transpose(3, 5, 2, 0, 1, 4).reshape(4, Hp, Lcin)

    kernel = _make_kernel(N, C_mid, C_out, F, Hp, Wp, Lcin)

    out_slab = pl.pallas_call(
        kernel,
        out_shape=jax.ShapeDtypeStruct((Hp, C_out * NWp), jnp.float32),
        grid=(C_mid,),
        in_specs=[
            pl.BlockSpec((4, Hp, Lcin), lambda m: (0, 0, 0)),          # pooled quads
            pl.BlockSpec((None, 3 * Lcin, NWp), lambda m: (m, 0, 0)),  # conv matrix
            pl.BlockSpec((None, NWp, F * NWp), lambda m: (m, 0, 0)),   # box col mix
            pl.BlockSpec((None, F * Hp, Hp), lambda m: (m, 0, 0)),     # box row mix
            pl.BlockSpec(memory_space=pltpu.MemorySpace.SMEM),         # scalars
        ],
        out_specs=pl.BlockSpec((Hp, F * NWp), lambda m: (0, m)),
        compiler_params=pltpu.CompilerParams(
            dimension_semantics=("parallel",),
            vmem_limit_bytes=32 * 1024 * 1024,
        ),
    )(xp, cm, wc, wr, scal)

    # Unpack channel-major lane-dense slab (Hp, C_out*N*Wp), lanes=(oc,n,q) -> NCHW.
    return out_slab.reshape(Hp, C_out, N, Wp).transpose(2, 1, 0, 3)


if __name__ == "__main__":
    key = jax.random.PRNGKey(0)
    kx, kp = jax.random.split(key)

    N, in_channels, H, W = 2, 4, 16, 16
    out_channels = 8
    # Box conv sees the post-maxpool resolution.
    max_input_h, max_input_w = H // 2, W // 2

    x = jax.random.normal(kx, (N, in_channels, H, W), jnp.float32)
    params = init_params(kp, in_channels, out_channels, max_input_h, max_input_w)

    out = down_forward(x, params)
    out = jax.block_until_ready(out)

    assert out.shape == (N, out_channels, H // 2, W // 2), out.shape
    assert bool(jnp.all(jnp.isfinite(out)))
    print("KERNEL_OK")
</pallas_src>

<mosaic_0001>
module attributes {stable_mosaic.version = 11 : i64} {
  func.func @kernel(%arg0: i32, %arg1: memref<4x8x64xf32, #tpu.memory_space<vmem>>, %arg2: memref<1x192x16xbf16, #tpu.memory_space<vmem>>, %arg3: memref<1x16x128xbf16, #tpu.memory_space<vmem>>, %arg4: memref<1x64x8xf32, #tpu.memory_space<vmem>>, %arg5: memref<19xf32, #tpu.memory_space<smem>>, %arg6: memref<8x128xf32, #tpu.memory_space<vmem>>) attributes {dimension_semantics = [#tpu.dimension_semantics<parallel>], iteration_bounds = array<i64: 1>, scalar_prefetch = 0 : i64, scratch_operands = 0 : i64, tpu.core_type = #tpu.core_type<tc>, window_params = [{pipeline_mode = #tpu.pipeline_mode<synchronous>, transform_indices = @transform_0, window_bounds = array<i64: 4, 8, 64>}, {transform_indices = @transform_1, window_bounds = array<i64: 1, 192, 16>}, {transform_indices = @transform_2, window_bounds = array<i64: 1, 16, 128>}, {transform_indices = @transform_3, window_bounds = array<i64: 1, 64, 8>}, {transform_indices = @transform_4, window_bounds = array<i64: 19>}, {transform_indices = @transform_5, window_bounds = array<i64: 8, 128>}]} {
    %c0 = arith.constant 0 : index
    %c0_0 = arith.constant 0 : index
    %c0_1 = arith.constant 0 : index
    %0 = vector.load %arg1[%c0, %c0_0, %c0_1] : memref<4x8x64xf32, #tpu.memory_space<vmem>>, vector<1x8x64xf32>
    %1 = vector.shape_cast %0 : vector<1x8x64xf32> to vector<8x64xf32>
    %c1 = arith.constant 1 : index
    %c0_2 = arith.constant 0 : index
    %c0_3 = arith.constant 0 : index
    %2 = vector.load %arg1[%c1, %c0_2, %c0_3] : memref<4x8x64xf32, #tpu.memory_space<vmem>>, vector<1x8x64xf32>
    %3 = vector.shape_cast %2 : vector<1x8x64xf32> to vector<8x64xf32>
    %4 = arith.maximumf %1, %3 : vector<8x64xf32>
    %c2 = arith.constant 2 : index
    %c0_4 = arith.constant 0 : index
    %c0_5 = arith.constant 0 : index
    %5 = vector.load %arg1[%c2, %c0_4, %c0_5] : memref<4x8x64xf32, #tpu.memory_space<vmem>>, vector<1x8x64xf32>
    %6 = vector.shape_cast %5 : vector<1x8x64xf32> to vector<8x64xf32>
    %c3 = arith.constant 3 : index
    %c0_6 = arith.constant 0 : index
    %c0_7 = arith.constant 0 : index
    %7 = vector.load %arg1[%c3, %c0_6, %c0_7] : memref<4x8x64xf32, #tpu.memory_space<vmem>>, vector<1x8x64xf32>
    %8 = vector.shape_cast %7 : vector<1x8x64xf32> to vector<8x64xf32>
    %9 = arith.maximumf %6, %8 : vector<8x64xf32>
    %10 = arith.maximumf %4, %9 : vector<8x64xf32>
    %11 = tpu.iota {dimensions = array<i32: 0>} : vector<8x64xi32>
    %c0_i32 = arith.constant 0 : i32
    %12 = vector.broadcast %c0_i32 : i32 to vector<8x64xi32>
    %13 = arith.cmpi eq, %11, %12 : vector<8x64xi32>
    %c1_i32 = arith.constant 1 : i32
    %14 = tpu.dynamic_rotate %10 by %c1_i32 dim 0 : vector<8x64xf32>, i32 -> vector<8x64xf32>
    %cst = arith.constant 0.000000e+00 : f32
    %15 = vector.broadcast %cst : f32 to vector<8x64xf32>
    %16 = arith.select %13, %15, %14 : vector<8x64xi1>, vector<8x64xf32>
    %c7_i32 = arith.constant 7 : i32
    %17 = vector.broadcast %c7_i32 : i32 to vector<8x64xi32>
    %18 = arith.cmpi eq, %11, %17 : vector<8x64xi32>
    %c7_i32_8 = arith.constant 7 : i32
    %19 = tpu.dynamic_rotate %10 by %c7_i32_8 dim 0 : vector<8x64xf32>, i32 -> vector<8x64xf32>
    %cst_9 = arith.constant 0.000000e+00 : f32
    %20 = vector.broadcast %cst_9 : f32 to vector<8x64xf32>
    %21 = arith.select %18, %20, %19 : vector<8x64xi1>, vector<8x64xf32>
    %c0_10 = arith.constant 0 : index
    %c0_11 = arith.constant 0 : index
    %c0_12 = arith.constant 0 : index
    %22 = vector.load %arg2[%c0_10, %c0_11, %c0_12] : memref<1x192x16xbf16, #tpu.memory_space<vmem>>, vector<1x192x16xbf16>
    %23 = vector.shape_cast %22 : vector<1x192x16xbf16> to vector<192x16xbf16>
    %24 = arith.truncf %16 : vector<8x64xf32> to vector<8x64xbf16>
    %25 = vector.extract_strided_slice %23 {offsets = [0, 0], sizes = [64, 16], strides = [1, 1]} : vector<192x16xbf16> to vector<64x16xbf16>
    %cst_13 = arith.constant dense<0.000000e+00> : vector<8x16xf32>
    %26 = tpu.matmul %24, %25, %cst_13 {dimension_numbers = #tpu.dot_dimension_numbers<[1], [0], [0], [1], [0, 0, 1, 1], [], []>} : vector<8x64xbf16>, vector<64x16xbf16>, vector<8x16xf32> -> vector<8x16xf32>
    %27 = arith.truncf %10 : vector<8x64xf32> to vector<8x64xbf16>
    %28 = vector.extract_strided_slice %23 {offsets = [64, 0], sizes = [64, 16], strides = [1, 1]} : vector<192x16xbf16> to vector<64x16xbf16>
    %cst_14 = arith.constant dense<0.000000e+00> : vector<8x16xf32>
    %29 = tpu.matmul %27, %28, %cst_14 {dimension_numbers = #tpu.dot_dimension_numbers<[1], [0], [0], [1], [0, 0, 1, 1], [], []>} : vector<8x64xbf16>, vector<64x16xbf16>, vector<8x16xf32> -> vector<8x16xf32>
    %30 = arith.addf %26, %29 : vector<8x16xf32>
    %31 = arith.truncf %21 : vector<8x64xf32> to vector<8x64xbf16>
    %32 = vector.extract_strided_slice %23 {offsets = [128, 0], sizes = [64, 16], strides = [1, 1]} : vector<192x16xbf16> to vector<64x16xbf16>
    %cst_15 = arith.constant dense<0.000000e+00> : vector<8x16xf32>
    %33 = tpu.matmul %31, %32, %cst_15 {dimension_numbers = #tpu.dot_dimension_numbers<[1], [0], [0], [1], [0, 0, 1, 1], [], []>} : vector<8x64xbf16>, vector<64x16xbf16>, vector<8x16xf32> -> vector<8x16xf32>
    %34 = arith.addf %30, %33 : vector<8x16xf32>
    %35 = arith.index_cast %arg0 : i32 to index
    %36 = memref.load %arg5[%35] : memref<19xf32, #tpu.memory_space<smem>>
    %37 = vector.broadcast %36 : f32 to vector<8x16xf32>
    %38 = arith.addf %34, %37 : vector<8x16xf32>
    %39 = vector.shape_cast %38 : vector<8x16xf32> to vector<1x8x16xf32>
    %cst_16 = arith.constant dense<0.000000e+00> : vector<1xf32>
    %40 = vector.multi_reduction <add>, %39, %cst_16 [1, 2] : vector<1x8x16xf32> to vector<1xf32>
    %41 = vector.shape_cast %40 : vector<1xf32> to vector<1x1x1xf32>
    %42 = vector.extract %41[0, 0, 0] : f32 from vector<1x1x1xf32>
    %cst_17 = arith.constant 7.812500e-03 : f32
    %43 = arith.mulf %42, %cst_17 : f32
    %44 = arith.mulf %38, %38 : vector<8x16xf32>
    %45 = vector.shape_cast %44 : vector<8x16xf32> to vector<1x8x16xf32>
    %cst_18 = arith.constant dense<0.000000e+00> : vector<1xf32>
    %46 = vector.multi_reduction <add>, %45, %cst_18 [1, 2] : vector<1x8x16xf32> to vector<1xf32>
    %47 = vector.shape_cast %46 : vector<1xf32> to vector<1x1x1xf32>
    %48 = vector.extract %47[0, 0, 0] : f32 from vector<1x1x1xf32>
    %cst_19 = arith.constant 7.812500e-03 : f32
    %49 = arith.mulf %48, %cst_19 : f32
    %50 = arith.mulf %43, %43 : f32
    %51 = arith.subf %49, %50 : f32
    %cst_20 = arith.constant 0.000000e+00 : f32
    %52 = arith.maximumf %51, %cst_20 : f32
    %c1_i32_21 = arith.constant 1 : i32
    %53 = arith.addi %c1_i32_21, %arg0 : i32
    %54 = arith.index_cast %53 : i32 to index
    %55 = memref.load %arg5[%54] : memref<19xf32, #tpu.memory_space<smem>>
    %cst_22 = arith.constant 9.99999974E-6 : f32
    %56 = arith.addf %52, %cst_22 : f32
    %57 = math.rsqrt %56 : f32
    %58 = arith.mulf %55, %57 : f32
    %c2_i32 = arith.constant 2 : i32
    %59 = arith.addi %c2_i32, %arg0 : i32
    %60 = arith.index_cast %59 : i32 to index
    %61 = memref.load %arg5[%60] : memref<19xf32, #tpu.memory_space<smem>>
    %62 = vector.broadcast %43 : f32 to vector<8x16xf32>
    %63 = arith.subf %38, %62 : vector<8x16xf32>
    %64 = vector.broadcast %58 : f32 to vector<8x16xf32>
    %65 = arith.mulf %63, %64 : vector<8x16xf32>
    %66 = vector.broadcast %61 : f32 to vector<8x16xf32>
    %67 = arith.addf %65, %66 : vector<8x16xf32>
    %cst_23 = arith.constant 0.000000e+00 : f32
    %68 = vector.broadcast %cst_23 : f32 to vector<8x16xf32>
    %69 = arith.maximumf %67, %68 : vector<8x16xf32>
    %70 = arith.truncf %69 : vector<8x16xf32> to vector<8x16xbf16>
    %c0_24 = arith.constant 0 : index
    %c0_25 = arith.constant 0 : index
    %c0_26 = arith.constant 0 : index
    %71 = vector.load %arg3[%c0_24, %c0_25, %c0_26] : memref<1x16x128xbf16, #tpu.memory_space<vmem>>, vector<1x16x128xbf16>
    %72 = vector.shape_cast %71 : vector<1x16x128xbf16> to vector<16x128xbf16>
    %cst_27 = arith.constant dense<0.000000e+00> : vector<8x128xf32>
    %73 = tpu.matmul %70, %72, %cst_27 {dimension_numbers = #tpu.dot_dimension_numbers<[1], [0], [0], [1], [0, 0, 1, 1], [], []>} : vector<8x16xbf16>, vector<16x128xbf16>, vector<8x128xf32> -> vector<8x128xf32>
    %c0_28 = arith.constant 0 : index
    %c0_29 = arith.constant 0 : index
    %c0_30 = arith.constant 0 : index
    %74 = vector.load %arg4[%c0_28, %c0_29, %c0_30] : memref<1x64x8xf32, #tpu.memory_space<vmem>>, vector<1x64x8xf32>
    %75 = vector.shape_cast %74 : vector<1x64x8xf32> to vector<64x8xf32>
    %76 = vector.extract_strided_slice %75 {offsets = [0, 0], sizes = [8, 8], strides = [1, 1]} : vector<64x8xf32> to vector<8x8xf32>
    %77 = vector.extract_strided_slice %73 {offsets = [0, 0], sizes = [8, 16], strides = [1, 1]} : vector<8x128xf32> to vector<8x16xf32>
    %cst_31 = arith.constant dense<0.000000e+00> : vector<8x16xf32>
    %78 = tpu.matmul %76, %77, %cst_31 {dimension_numbers = #tpu.dot_dimension_numbers<[1], [0], [0], [1], [0, 0, 1, 1], [], []>} : vector<8x8xf32>, vector<8x16xf32>, vector<8x16xf32> -> vector<8x16xf32>
    %79 = vector.shape_cast %78 : vector<8x16xf32> to vector<1x8x16xf32>
    %cst_32 = arith.constant dense<0.000000e+00> : vector<1xf32>
    %80 = vector.multi_reduction <add>, %79, %cst_32 [1, 2] : vector<1x8x16xf32> to vector<1xf32>
    %81 = vector.shape_cast %80 : vector<1xf32> to vector<1x1x1xf32>
    %82 = vector.extract %81[0, 0, 0] : f32 from vector<1x1x1xf32>
    %cst_33 = arith.constant 7.812500e-03 : f32
    %83 = arith.mulf %82, %cst_33 : f32
    %84 = arith.mulf %78, %78 : vector<8x16xf32>
    %85 = vector.shape_cast %84 : vector<8x16xf32> to vector<1x8x16xf32>
    %cst_34 = arith.constant dense<0.000000e+00> : vector<1xf32>
    %86 = vector.multi_reduction <add>, %85, %cst_34 [1, 2] : vector<1x8x16xf32> to vector<1xf32>
    %87 = vector.shape_cast %86 : vector<1xf32> to vector<1x1x1xf32>
    %88 = vector.extract %87[0, 0, 0] : f32 from vector<1x1x1xf32>
    %cst_35 = arith.constant 7.812500e-03 : f32
    %89 = arith.mulf %88, %cst_35 : f32
    %90 = arith.mulf %83, %83 : f32
    %91 = arith.subf %89, %90 : f32
    %cst_36 = arith.constant 0.000000e+00 : f32
    %92 = arith.maximumf %91, %cst_36 : f32
    %c8_i32 = arith.constant 8 : i32
    %93 = arith.muli %arg0, %c8_i32 : i32
    %c0_i32_37 = arith.constant 0 : i32
    %94 = arith.addi %93, %c0_i32_37 : i32
    %c3_i32 = arith.constant 3 : i32
    %95 = arith.addi %c3_i32, %94 : i32
    %96 = arith.index_cast %95 : i32 to index
    %97 = memref.load %arg5[%96] : memref<19xf32, #tpu.memory_space<smem>>
    %cst_38 = arith.constant 9.99999974E-6 : f32
    %98 = arith.addf %92, %cst_38 : f32
    %99 = math.rsqrt %98 : f32
    %100 = arith.mulf %97, %99 : f32
    %c11_i32 = arith.constant 11 : i32
    %101 = arith.addi %c11_i32, %94 : i32
    %102 = arith.index_cast %101 : i32 to index
    %103 = memref.load %arg5[%102] : memref<19xf32, #tpu.memory_space<smem>>
    %104 = vector.broadcast %83 : f32 to vector<8x16xf32>
    %105 = arith.subf %78, %104 : vector<8x16xf32>
    %106 = vector.broadcast %100 : f32 to vector<8x16xf32>
    %107 = arith.mulf %105, %106 : vector<8x16xf32>
    %108 = vector.broadcast %103 : f32 to vector<8x16xf32>
    %109 = arith.addf %107, %108 : vector<8x16xf32>
    %cst_39 = arith.constant 0.000000e+00 : f32
    %110 = vector.broadcast %cst_39 : f32 to vector<8x16xf32>
    %111 = arith.maximumf %109, %110 : vector<8x16xf32>
    %112 = vector.extract_strided_slice %75 {offsets = [8, 0], sizes = [8, 8], strides = [1, 1]} : vector<64x8xf32> to vector<8x8xf32>
    %113 = vector.extract_strided_slice %73 {offsets = [0, 16], sizes = [8, 16], strides = [1, 1]} : vector<8x128xf32> to vector<8x16xf32>
    %cst_40 = arith.constant dense<0.000000e+00> : vector<8x16xf32>
    %114 = tpu.matmul %112, %113, %cst_40 {dimension_numbers = #tpu.dot_dimension_numbers<[1], [0], [0], [1], [0, 0, 1, 1], [], []>} : vector<8x8xf32>, vector<8x16xf32>, vector<8x16xf32> -> vector<8x16xf32>
    %115 = vector.shape_cast %114 : vector<8x16xf32> to vector<1x8x16xf32>
    %cst_41 = arith.constant dense<0.000000e+00> : vector<1xf32>
    %116 = vector.multi_reduction <add>, %115, %cst_41 [1, 2] : vector<1x8x16xf32> to vector<1xf32>
    %117 = vector.shape_cast %116 : vector<1xf32> to vector<1x1x1xf32>
    %118 = vector.extract %117[0, 0, 0] : f32 from vector<1x1x1xf32>
    %cst_42 = arith.constant 7.812500e-03 : f32
    %119 = arith.mulf %118, %cst_42 : f32
    %120 = arith.mulf %114, %114 : vector<8x16xf32>
    %121 = vector.shape_cast %120 : vector<8x16xf32> to vector<1x8x16xf32>
    %cst_43 = arith.constant dense<0.000000e+00> : vector<1xf32>
    %122 = vector.multi_reduction <add>, %121, %cst_43 [1, 2] : vector<1x8x16xf32> to vector<1xf32>
    %123 = vector.shape_cast %122 : vector<1xf32> to vector<1x1x1xf32>
    %124 = vector.extract %123[0, 0, 0] : f32 from vector<1x1x1xf32>
    %cst_44 = arith.constant 7.812500e-03 : f32
    %125 = arith.mulf %124, %cst_44 : f32
    %126 = arith.mulf %119, %119 : f32
    %127 = arith.subf %125, %126 : f32
    %cst_45 = arith.constant 0.000000e+00 : f32
    %128 = arith.maximumf %127, %cst_45 : f32
    %c8_i32_46 = arith.constant 8 : i32
    %129 = arith.muli %arg0, %c8_i32_46 : i32
    %c1_i32_47 = arith.constant 1 : i32
    %130 = arith.addi %129, %c1_i32_47 : i32
    %c3_i32_48 = arith.constant 3 : i32
    %131 = arith.addi %c3_i32_48, %130 : i32
    %132 = arith.index_cast %131 : i32 to index
    %133 = memref.load %arg5[%132] : memref<19xf32, #tpu.memory_space<smem>>
    %cst_49 = arith.constant 9.99999974E-6 : f32
    %134 = arith.addf %128, %cst_49 : f32
    %135 = math.rsqrt %134 : f32
    %136 = arith.mulf %133, %135 : f32
    %c11_i32_50 = arith.constant 11 : i32
    %137 = arith.addi %c11_i32_50, %130 : i32
    %138 = arith.index_cast %137 : i32 to index
    %139 = memref.load %arg5[%138] : memref<19xf32, #tpu.memory_space<smem>>
    %140 = vector.broadcast %119 : f32 to vector<8x16xf32>
    %141 = arith.subf %114, %140 : vector<8x16xf32>
    %142 = vector.broadcast %136 : f32 to vector<8x16xf32>
    %143 = arith.mulf %141, %142 : vector<8x16xf32>
    %144 = vector.broadcast %139 : f32 to vector<8x16xf32>
    %145 = arith.addf %143, %144 : vector<8x16xf32>
    %cst_51 = arith.constant 0.000000e+00 : f32
    %146 = vector.broadcast %cst_51 : f32 to vector<8x16xf32>
    %147 = arith.maximumf %145, %146 : vector<8x16xf32>
    %148 = vector.extract_strided_slice %75 {offsets = [16, 0], sizes = [8, 8], strides = [1, 1]} : vector<64x8xf32> to vector<8x8xf32>
    %149 = vector.extract_strided_slice %73 {offsets = [0, 32], sizes = [8, 16], strides = [1, 1]} : vector<8x128xf32> to vector<8x16xf32>
    %cst_52 = arith.constant dense<0.000000e+00> : vector<8x16xf32>
    %150 = tpu.matmul %148, %149, %cst_52 {dimension_numbers = #tpu.dot_dimension_numbers<[1], [0], [0], [1], [0, 0, 1, 1], [], []>} : vector<8x8xf32>, vector<8x16xf32>, vector<8x16xf32> -> vector<8x16xf32>
    %151 = vector.shape_cast %150 : vector<8x16xf32> to vector<1x8x16xf32>
    %cst_53 = arith.constant dense<0.000000e+00> : vector<1xf32>
    %152 = vector.multi_reduction <add>, %151, %cst_53 [1, 2] : vector<1x8x16xf32> to vector<1xf32>
    %153 = vector.shape_cast %152 : vector<1xf32> to vector<1x1x1xf32>
    %154 = vector.extract %153[0, 0, 0] : f32 from vector<1x1x1xf32>
    %cst_54 = arith.constant 7.812500e-03 : f32
    %155 = arith.mulf %154, %cst_54 : f32
    %156 = arith.mulf %150, %150 : vector<8x16xf32>
    %157 = vector.shape_cast %156 : vector<8x16xf32> to vector<1x8x16xf32>
    %cst_55 = arith.constant dense<0.000000e+00> : vector<1xf32>
    %158 = vector.multi_reduction <add>, %157, %cst_55 [1, 2] : vector<1x8x16xf32> to vector<1xf32>
    %159 = vector.shape_cast %158 : vector<1xf32> to vector<1x1x1xf32>
    %160 = vector.extract %159[0, 0, 0] : f32 from vector<1x1x1xf32>
    %cst_56 = arith.constant 7.812500e-03 : f32
    %161 = arith.mulf %160, %cst_56 : f32
    %162 = arith.mulf %155, %155 : f32
    %163 = arith.subf %161, %162 : f32
    %cst_57 = arith.constant 0.000000e+00 : f32
    %164 = arith.maximumf %163, %cst_57 : f32
    %c8_i32_58 = arith.constant 8 : i32
    %165 = arith.muli %arg0, %c8_i32_58 : i32
    %c2_i32_59 = arith.constant 2 : i32
    %166 = arith.addi %165, %c2_i32_59 : i32
    %c3_i32_60 = arith.constant 3 : i32
    %167 = arith.addi %c3_i32_60, %166 : i32
    %168 = arith.index_cast %167 : i32 to index
    %169 = memref.load %arg5[%168] : memref<19xf32, #tpu.memory_space<smem>>
    %cst_61 = arith.constant 9.99999974E-6 : f32
    %170 = arith.addf %164, %cst_61 : f32
    %171 = math.rsqrt %170 : f32
    %172 = arith.mulf %169, %171 : f32
    %c11_i32_62 = arith.constant 11 : i32
    %173 = arith.addi %c11_i32_62, %166 : i32
    %174 = arith.index_cast %173 : i32 to index
    %175 = memref.load %arg5[%174] : memref<19xf32, #tpu.memory_space<smem>>
    %176 = vector.broadcast %155 : f32 to vector<8x16xf32>
    %177 = arith.subf %150, %176 : vector<8x16xf32>
    %178 = vector.broadcast %172 : f32 to vector<8x16xf32>
    %179 = arith.mulf %177, %178 : vector<8x16xf32>
    %180 = vector.broadcast %175 : f32 to vector<8x16xf32>
    %181 = arith.addf %179, %180 : vector<8x16xf32>
    %cst_63 = arith.constant 0.000000e+00 : f32
    %182 = vector.broadcast %cst_63 : f32 to vector<8x16xf32>
    %183 = arith.maximumf %181, %182 : vector<8x16xf32>
    %184 = vector.extract_strided_slice %75 {offsets = [24, 0], sizes = [8, 8], strides = [1, 1]} : vector<64x8xf32> to vector<8x8xf32>
    %185 = vector.extract_strided_slice %73 {offsets = [0, 48], sizes = [8, 16], strides = [1, 1]} : vector<8x128xf32> to vector<8x16xf32>
    %cst_64 = arith.constant dense<0.000000e+00> : vector<8x16xf32>
    %186 = tpu.matmul %184, %185, %cst_64 {dimension_numbers = #tpu.dot_dimension_numbers<[1], [0], [0], [1], [0, 0, 1, 1], [], []>} : vector<8x8xf32>, vector<8x16xf32>, vector<8x16xf32> -> vector<8x16xf32>
    %187 = vector.shape_cast %186 : vector<8x16xf32> to vector<1x8x16xf32>
    %cst_65 = arith.constant dense<0.000000e+00> : vector<1xf32>
    %188 = vector.multi_reduction <add>, %187, %cst_65 [1, 2] : vector<1x8x16xf32> to vector<1xf32>
    %189 = vector.shape_cast %188 : vector<1xf32> to vector<1x1x1xf32>
    %190 = vector.extract %189[0, 0, 0] : f32 from vector<1x1x1xf32>
    %cst_66 = arith.constant 7.812500e-03 : f32
    %191 = arith.mulf %190, %cst_66 : f32
    %192 = arith.mulf %186, %186 : vector<8x16xf32>
    %193 = vector.shape_cast %192 : vector<8x16xf32> to vector<1x8x16xf32>
    %cst_67 = arith.constant dense<0.000000e+00> : vector<1xf32>
    %194 = vector.multi_reduction <add>, %193, %cst_67 [1, 2] : vector<1x8x16xf32> to vector<1xf32>
    %195 = vector.shape_cast %194 : vector<1xf32> to vector<1x1x1xf32>
    %196 = vector.extract %195[0, 0, 0] : f32 from vector<1x1x1xf32>
    %cst_68 = arith.constant 7.812500e-03 : f32
    %197 = arith.mulf %196, %cst_68 : f32
    %198 = arith.mulf %191, %191 : f32
    %199 = arith.subf %197, %198 : f32
    %cst_69 = arith.constant 0.000000e+00 : f32
    %200 = arith.maximumf %199, %cst_69 : f32
    %c8_i32_70 = arith.constant 8 : i32
    %201 = arith.muli %arg0, %c8_i32_70 : i32
    %c3_i32_71 = arith.constant 3 : i32
    %202 = arith.addi %201, %c3_i32_71 : i32
    %c3_i32_72 = arith.constant 3 : i32
    %203 = arith.addi %c3_i32_72, %202 : i32
    %204 = arith.index_cast %203 : i32 to index
    %205 = memref.load %arg5[%204] : memref<19xf32, #tpu.memory_space<smem>>
    %cst_73 = arith.constant 9.99999974E-6 : f32
    %206 = arith.addf %200, %cst_73 : f32
    %207 = math.rsqrt %206 : f32
    %208 = arith.mulf %205, %207 : f32
    %c11_i32_74 = arith.constant 11 : i32
    %209 = arith.addi %c11_i32_74, %202 : i32
    %210 = arith.index_cast %209 : i32 to index
    %211 = memref.load %arg5[%210] : memref<19xf32, #tpu.memory_space<smem>>
    %212 = vector.broadcast %191 : f32 to vector<8x16xf32>
    %213 = arith.subf %186, %212 : vector<8x16xf32>
    %214 = vector.broadcast %208 : f32 to vector<8x16xf32>
    %215 = arith.mulf %213, %214 : vector<8x16xf32>
    %216 = vector.broadcast %211 : f32 to vector<8x16xf32>
    %217 = arith.addf %215, %216 : vector<8x16xf32>
    %cst_75 = arith.constant 0.000000e+00 : f32
    %218 = vector.broadcast %cst_75 : f32 to vector<8x16xf32>
    %219 = arith.maximumf %217, %218 : vector<8x16xf32>
    %220 = vector.extract_strided_slice %75 {offsets = [32, 0], sizes = [8, 8], strides = [1, 1]} : vector<64x8xf32> to vector<8x8xf32>
    %221 = vector.extract_strided_slice %73 {offsets = [0, 64], sizes = [8, 16], strides = [1, 1]} : vector<8x128xf32> to vector<8x16xf32>
    %cst_76 = arith.constant dense<0.000000e+00> : vector<8x16xf32>
    %222 = tpu.matmul %220, %221, %cst_76 {dimension_numbers = #tpu.dot_dimension_numbers<[1], [0], [0], [1], [0, 0, 1, 1], [], []>} : vector<8x8xf32>, vector<8x16xf32>, vector<8x16xf32> -> vector<8x16xf32>
    %223 = vector.shape_cast %222 : vector<8x16xf32> to vector<1x8x16xf32>
    %cst_77 = arith.constant dense<0.000000e+00> : vector<1xf32>
    %224 = vector.multi_reduction <add>, %223, %cst_77 [1, 2] : vector<1x8x16xf32> to vector<1xf32>
    %225 = vector.shape_cast %224 : vector<1xf32> to vector<1x1x1xf32>
    %226 = vector.extract %225[0, 0, 0] : f32 from vector<1x1x1xf32>
    %cst_78 = arith.constant 7.812500e-03 : f32
    %227 = arith.mulf %226, %cst_78 : f32
    %228 = arith.mulf %222, %222 : vector<8x16xf32>
    %229 = vector.shape_cast %228 : vector<8x16xf32> to vector<1x8x16xf32>
    %cst_79 = arith.constant dense<0.000000e+00> : vector<1xf32>
    %230 = vector.multi_reduction <add>, %229, %cst_79 [1, 2] : vector<1x8x16xf32> to vector<1xf32>
    %231 = vector.shape_cast %230 : vector<1xf32> to vector<1x1x1xf32>
    %232 = vector.extract %231[0, 0, 0] : f32 from vector<1x1x1xf32>
    %cst_80 = arith.constant 7.812500e-03 : f32
    %233 = arith.mulf %232, %cst_80 : f32
    %234 = arith.mulf %227, %227 : f32
    %235 = arith.subf %233, %234 : f32
    %cst_81 = arith.constant 0.000000e+00 : f32
    %236 = arith.maximumf %235, %cst_81 : f32
    %c8_i32_82 = arith.constant 8 : i32
    %237 = arith.muli %arg0, %c8_i32_82 : i32
    %c4_i32 = arith.constant 4 : i32
    %238 = arith.addi %237, %c4_i32 : i32
    %c3_i32_83 = arith.constant 3 : i32
    %239 = arith.addi %c3_i32_83, %238 : i32
    %240 = arith.index_cast %239 : i32 to index
    %241 = memref.load %arg5[%240] : memref<19xf32, #tpu.memory_space<smem>>
    %cst_84 = arith.constant 9.99999974E-6 : f32
    %242 = arith.addf %236, %cst_84 : f32
    %243 = math.rsqrt %242 : f32
    %244 = arith.mulf %241, %243 : f32
    %c11_i32_85 = arith.constant 11 : i32
    %245 = arith.addi %c11_i32_85, %238 : i32
    %246 = arith.index_cast %245 : i32 to index
    %247 = memref.load %arg5[%246] : memref<19xf32, #tpu.memory_space<smem>>
    %248 = vector.broadcast %227 : f32 to vector<8x16xf32>
    %249 = arith.subf %222, %248 : vector<8x16xf32>
    %250 = vector.broadcast %244 : f32 to vector<8x16xf32>
    %251 = arith.mulf %249, %250 : vector<8x16xf32>
    %252 = vector.broadcast %247 : f32 to vector<8x16xf32>
    %253 = arith.addf %251, %252 : vector<8x16xf32>
    %cst_86 = arith.constant 0.000000e+00 : f32
    %254 = vector.broadcast %cst_86 : f32 to vector<8x16xf32>
    %255 = arith.maximumf %253, %254 : vector<8x16xf32>
    %256 = vector.extract_strided_slice %75 {offsets = [40, 0], sizes = [8, 8], strides = [1, 1]} : vector<64x8xf32> to vector<8x8xf32>
    %257 = vector.extract_strided_slice %73 {offsets = [0, 80], sizes = [8, 16], strides = [1, 1]} : vector<8x128xf32> to vector<8x16xf32>
    %cst_87 = arith.constant dense<0.000000e+00> : vector<8x16xf32>
    %258 = tpu.matmul %256, %257, %cst_87 {dimension_numbers = #tpu.dot_dimension_numbers<[1], [0], [0], [1], [0, 0, 1, 1], [], []>} : vector<8x8xf32>, vector<8x16xf32>, vector<8x16xf32> -> vector<8x16xf32>
    %259 = vector.shape_cast %258 : vector<8x16xf32> to vector<1x8x16xf32>
    %cst_88 = arith.constant dense<0.000000e+00> : vector<1xf32>
    %260 = vector.multi_reduction <add>, %259, %cst_88 [1, 2] : vector<1x8x16xf32> to vector<1xf32>
    %261 = vector.shape_cast %260 : vector<1xf32> to vector<1x1x1xf32>
    %262 = vector.extract %261[0, 0, 0] : f32 from vector<1x1x1xf32>
    %cst_89 = arith.constant 7.812500e-03 : f32
    %263 = arith.mulf %262, %cst_89 : f32
    %264 = arith.mulf %258, %258 : vector<8x16xf32>
    %265 = vector.shape_cast %264 : vector<8x16xf32> to vector<1x8x16xf32>
    %cst_90 = arith.constant dense<0.000000e+00> : vector<1xf32>
    %266 = vector.multi_reduction <add>, %265, %cst_90 [1, 2] : vector<1x8x16xf32> to vector<1xf32>
    %267 = vector.shape_cast %266 : vector<1xf32> to vector<1x1x1xf32>
    %268 = vector.extract %267[0, 0, 0] : f32 from vector<1x1x1xf32>
    %cst_91 = arith.constant 7.812500e-03 : f32
    %269 = arith.mulf %268, %cst_91 : f32
    %270 = arith.mulf %263, %263 : f32
    %271 = arith.subf %269, %270 : f32
    %cst_92 = arith.constant 0.000000e+00 : f32
    %272 = arith.maximumf %271, %cst_92 : f32
    %c8_i32_93 = arith.constant 8 : i32
    %273 = arith.muli %arg0, %c8_i32_93 : i32
    %c5_i32 = arith.constant 5 : i32
    %274 = arith.addi %273, %c5_i32 : i32
    %c3_i32_94 = arith.constant 3 : i32
    %275 = arith.addi %c3_i32_94, %274 : i32
    %276 = arith.index_cast %275 : i32 to index
    %277 = memref.load %arg5[%276] : memref<19xf32, #tpu.memory_space<smem>>
    %cst_95 = arith.constant 9.99999974E-6 : f32
    %278 = arith.addf %272, %cst_95 : f32
    %279 = math.rsqrt %278 : f32
    %280 = arith.mulf %277, %279 : f32
    %c11_i32_96 = arith.constant 11 : i32
    %281 = arith.addi %c11_i32_96, %274 : i32
    %282 = arith.index_cast %281 : i32 to index
    %283 = memref.load %arg5[%282] : memref<19xf32, #tpu.memory_space<smem>>
    %284 = vector.broadcast %263 : f32 to vector<8x16xf32>
    %285 = arith.subf %258, %284 : vector<8x16xf32>
    %286 = vector.broadcast %280 : f32 to vector<8x16xf32>
    %287 = arith.mulf %285, %286 : vector<8x16xf32>
    %288 = vector.broadcast %283 : f32 to vector<8x16xf32>
    %289 = arith.addf %287, %288 : vector<8x16xf32>
    %cst_97 = arith.constant 0.000000e+00 : f32
    %290 = vector.broadcast %cst_97 : f32 to vector<8x16xf32>
    %291 = arith.maximumf %289, %290 : vector<8x16xf32>
    %292 = vector.extract_strided_slice %75 {offsets = [48, 0], sizes = [8, 8], strides = [1, 1]} : vector<64x8xf32> to vector<8x8xf32>
    %293 = vector.extract_strided_slice %73 {offsets = [0, 96], sizes = [8, 16], strides = [1, 1]} : vector<8x128xf32> to vector<8x16xf32>
    %cst_98 = arith.constant dense<0.000000e+00> : vector<8x16xf32>
    %294 = tpu.matmul %292, %293, %cst_98 {dimension_numbers = #tpu.dot_dimension_numbers<[1], [0], [0], [1], [0, 0, 1, 1], [], []>} : vector<8x8xf32>, vector<8x16xf32>, vector<8x16xf32> -> vector<8x16xf32>
    %295 = vector.shape_cast %294 : vector<8x16xf32> to vector<1x8x16xf32>
    %cst_99 = arith.constant dense<0.000000e+00> : vector<1xf32>
    %296 = vector.multi_reduction <add>, %295, %cst_99 [1, 2] : vector<1x8x16xf32> to vector<1xf32>
    %297 = vector.shape_cast %296 : vector<1xf32> to vector<1x1x1xf32>
    %298 = vector.extract %297[0, 0, 0] : f32 from vector<1x1x1xf32>
    %cst_100 = arith.constant 7.812500e-03 : f32
    %299 = arith.mulf %298, %cst_100 : f32
    %300 = arith.mulf %294, %294 : vector<8x16xf32>
    %301 = vector.shape_cast %300 : vector<8x16xf32> to vector<1x8x16xf32>
    %cst_101 = arith.constant dense<0.000000e+00> : vector<1xf32>
    %302 = vector.multi_reduction <add>, %301, %cst_101 [1, 2] : vector<1x8x16xf32> to vector<1xf32>
    %303 = vector.shape_cast %302 : vector<1xf32> to vector<1x1x1xf32>
    %304 = vector.extract %303[0, 0, 0] : f32 from vector<1x1x1xf32>
    %cst_102 = arith.constant 7.812500e-03 : f32
    %305 = arith.mulf %304, %cst_102 : f32
    %306 = arith.mulf %299, %299 : f32
    %307 = arith.subf %305, %306 : f32
    %cst_103 = arith.constant 0.000000e+00 : f32
    %308 = arith.maximumf %307, %cst_103 : f32
    %c8_i32_104 = arith.constant 8 : i32
    %309 = arith.muli %arg0, %c8_i32_104 : i32
    %c6_i32 = arith.constant 6 : i32
    %310 = arith.addi %309, %c6_i32 : i32
    %c3_i32_105 = arith.constant 3 : i32
    %311 = arith.addi %c3_i32_105, %310 : i32
    %312 = arith.index_cast %311 : i32 to index
    %313 = memref.load %arg5[%312] : memref<19xf32, #tpu.memory_space<smem>>
    %cst_106 = arith.constant 9.99999974E-6 : f32
    %314 = arith.addf %308, %cst_106 : f32
    %315 = math.rsqrt %314 : f32
    %316 = arith.mulf %313, %315 : f32
    %c11_i32_107 = arith.constant 11 : i32
    %317 = arith.addi %c11_i32_107, %310 : i32
    %318 = arith.index_cast %317 : i32 to index
    %319 = memref.load %arg5[%318] : memref<19xf32, #tpu.memory_space<smem>>
    %320 = vector.broadcast %299 : f32 to vector<8x16xf32>
    %321 = arith.subf %294, %320 : vector<8x16xf32>
    %322 = vector.broadcast %316 : f32 to vector<8x16xf32>
    %323 = arith.mulf %321, %322 : vector<8x16xf32>
    %324 = vector.broadcast %319 : f32 to vector<8x16xf32>
    %325 = arith.addf %323, %324 : vector<8x16xf32>
    %cst_108 = arith.constant 0.000000e+00 : f32
    %326 = vector.broadcast %cst_108 : f32 to vector<8x16xf32>
    %327 = arith.maximumf %325, %326 : vector<8x16xf32>
    %328 = vector.extract_strided_slice %75 {offsets = [56, 0], sizes = [8, 8], strides = [1, 1]} : vector<64x8xf32> to vector<8x8xf32>
    %329 = vector.extract_strided_slice %73 {offsets = [0, 112], sizes = [8, 16], strides = [1, 1]} : vector<8x128xf32> to vector<8x16xf32>
    %cst_109 = arith.constant dense<0.000000e+00> : vector<8x16xf32>
    %330 = tpu.matmul %328, %329, %cst_109 {dimension_numbers = #tpu.dot_dimension_numbers<[1], [0], [0], [1], [0, 0, 1, 1], [], []>} : vector<8x8xf32>, vector<8x16xf32>, vector<8x16xf32> -> vector<8x16xf32>
    %331 = vector.shape_cast %330 : vector<8x16xf32> to vector<1x8x16xf32>
    %cst_110 = arith.constant dense<0.000000e+00> : vector<1xf32>
    %332 = vector.multi_reduction <add>, %331, %cst_110 [1, 2] : vector<1x8x16xf32> to vector<1xf32>
    %333 = vector.shape_cast %332 : vector<1xf32> to vector<1x1x1xf32>
    %334 = vector.extract %333[0, 0, 0] : f32 from vector<1x1x1xf32>
    %cst_111 = arith.constant 7.812500e-03 : f32
    %335 = arith.mulf %334, %cst_111 : f32
    %336 = arith.mulf %330, %330 : vector<8x16xf32>
    %337 = vector.shape_cast %336 : vector<8x16xf32> to vector<1x8x16xf32>
    %cst_112 = arith.constant dense<0.000000e+00> : vector<1xf32>
    %338 = vector.multi_reduction <add>, %337, %cst_112 [1, 2] : vector<1x8x16xf32> to vector<1xf32>
    %339 = vector.shape_cast %338 : vector<1xf32> to vector<1x1x1xf32>
    %340 = vector.extract %339[0, 0, 0] : f32 from vector<1x1x1xf32>
    %cst_113 = arith.constant 7.812500e-03 : f32
    %341 = arith.mulf %340, %cst_113 : f32
    %342 = arith.mulf %335, %335 : f32
    %343 = arith.subf %341, %342 : f32
    %cst_114 = arith.constant 0.000000e+00 : f32
    %344 = arith.maximumf %343, %cst_114 : f32
    %c8_i32_115 = arith.constant 8 : i32
    %345 = arith.muli %arg0, %c8_i32_115 : i32
    %c7_i32_116 = arith.constant 7 : i32
    %346 = arith.addi %345, %c7_i32_116 : i32
    %c3_i32_117 = arith.constant 3 : i32
    %347 = arith.addi %c3_i32_117, %346 : i32
    %348 = arith.index_cast %347 : i32 to index
    %349 = memref.load %arg5[%348] : memref<19xf32, #tpu.memory_space<smem>>
    %cst_118 = arith.constant 9.99999974E-6 : f32
    %350 = arith.addf %344, %cst_118 : f32
    %351 = math.rsqrt %350 : f32
    %352 = arith.mulf %349, %351 : f32
    %c11_i32_119 = arith.constant 11 : i32
    %353 = arith.addi %c11_i32_119, %346 : i32
    %354 = arith.index_cast %353 : i32 to index
    %355 = memref.load %arg5[%354] : memref<19xf32, #tpu.memory_space<smem>>
    %356 = vector.broadcast %335 : f32 to vector<8x16xf32>
    %357 = arith.subf %330, %356 : vector<8x16xf32>
    %358 = vector.broadcast %352 : f32 to vector<8x16xf32>
    %359 = arith.mulf %357, %358 : vector<8x16xf32>
    %360 = vector.broadcast %355 : f32 to vector<8x16xf32>
    %361 = arith.addf %359, %360 : vector<8x16xf32>
    %cst_120 = arith.constant 0.000000e+00 : f32
    %362 = vector.broadcast %cst_120 : f32 to vector<8x16xf32>
    %363 = arith.maximumf %361, %362 : vector<8x16xf32>
    %364 = tpu.concatenate %111, %147, %183, %219, %255, %291, %327, %363 in 1 : vector<8x16xf32>, vector<8x16xf32>, vector<8x16xf32>, vector<8x16xf32>, vector<8x16xf32>, vector<8x16xf32>, vector<8x16xf32>, vector<8x16xf32> -> vector<8x128xf32>
    %c0_121 = arith.constant 0 : index
    %c0_122 = arith.constant 0 : index
    %365 = vector.load %arg6[%c0_121, %c0_122] : memref<8x128xf32, #tpu.memory_space<vmem>>, vector<8x128xf32>
    tpu.vector_store %arg6[%c0_121, %c0_122], %364 {strides = array<i32>} : memref<8x128xf32, #tpu.memory_space<vmem>>, vector<8x128xf32>,
    return
  }
  func.func @transform_0(%arg0: i32) -> (i32, i32, i32) {
    %c0_i32 = arith.constant 0 : i32
    %c0_i32_0 = arith.constant 0 : i32
    %c0_i32_1 = arith.constant 0 : i32
    %c0_i32_2 = arith.constant 0 : i32
    return %c0_i32, %c0_i32_0, %c0_i32_1 : i32, i32, i32
  }
  func.func @transform_1(%arg0: i32) -> (i32, i32, i32) {
    %c0_i32 = arith.constant 0 : i32
    %c0_i32_0 = arith.constant 0 : i32
    %c0_i32_1 = arith.constant 0 : i32
    return %arg0, %c0_i32, %c0_i32_0 : i32, i32, i32
  }
  func.func @transform_2(%arg0: i32) -> (i32, i32, i32) {
    %c0_i32 = arith.constant 0 : i32
    %c0_i32_0 = arith.constant 0 : i32
    %c0_i32_1 = arith.constant 0 : i32
    return %arg0, %c0_i32, %c0_i32_0 : i32, i32, i32
  }
  func.func @transform_3(%arg0: i32) -> (i32, i32, i32) {
    %c0_i32 = arith.constant 0 : i32
    %c0_i32_0 = arith.constant 0 : i32
    %c0_i32_1 = arith.constant 0 : i32
    return %arg0, %c0_i32, %c0_i32_0 : i32, i32, i32
  }
  func.func @transform_4(%arg0: i32) -> i32 {
    %c0_i32 = arith.constant 0 : i32
    %c0_i32_0 = arith.constant 0 : i32
    return %c0_i32 : i32
  }
  func.func @transform_5(%arg0: i32) -> (i32, i32) {
    %c0_i32 = arith.constant 0 : i32
    %c0_i32_0 = arith.constant 0 : i32
    return %c0_i32, %arg0 : i32, i32
  }
}

</mosaic_0001>

<bundles_post_ra>
// kernel: tpu_custom_call.1
= control target key start
LH: loop header
LB: loop body
LE: loop exit
PB: predicated region body
PF: predicated region fallthrough
CT: control target
= control target key end

     0   :  { %10 = vsyncpa [#allocation4], 0  ;;  %s1984_s0 = inlined_call_operand.vmem [shape: f32[4,8,64], index: 0, kind: input, shape index: {}]   ;;  %s1985_s1 = inlined_call_operand.vmem [shape: bf16[1,192,16], index: 1, kind: input, shape index: {}]   ;;  %s1986_s2 = inlined_call_operand.vmem [shape: bf16[1,16,128], index: 2, kind: input, shape index: {}]   ;;  %s1987_s3 = inlined_call_operand.vmem [shape: f32[1,64,8], index: 3, kind: input, shape index: {}]   ;;  %s1988_s4 = inlined_call_operand.vmem [shape: f32[19], index: 4, kind: input, shape index: {}]   ;;  %s1989_s5 = inlined_call_operand.hbm [shape: f32[8,128], index: 5, kind: output, shape index: {}]  }
   0x1   :  { %11 = vsyncpa [#allocation3], 0  ;;  %s26_s20 = sshll.u32 %s1988_s4, 4  ;;  %s27_s20 = int_to_ptr.vmem [resolvable:$true] %s26_s20 }
   0x2   :  { %s1647_s21 = scalar_lea.vmem %s27_s20, 16  ;;  %p1652_p1 = scmp.lt.s32.totalorder %s27_s20, %s27_s20 }
   0x3   :  { %p1648_p0 = scmp.ne.s32.totalorder %s27_s20, %s1647_s21  ;;  %p1653_p2 = scmp.lt.s32.totalorder %s1647_s21, %s1647_s21 }
   0x5   :  { %p1654_p3 = por %p1653_p2, %p1652_p1 }
   0x7   :  { %p1655_p4 = pnand %p1654_p3, %p1648_p0 }
   0x9   :  { %1658 = shalt.err (!%p1655_p4)
}
   0xa   :  { %s1685_s22 = smov [#allocation2]  }
   0xb   :  { %29 = dma.vmem_to_smem %s27_s20, 16, %s1685_s22, [#allocation4]  }
   0xc   :  { %1681 = dma.done.wait [#allocation4], 16  }
   0xd   :  { %1682 = vsyncadd [#allocation4], 4294967280 }
   0xe   :  { %33 = sfence }
   0xf   :  { %v1616_v0 = vld [vmem:[%s1985_s1 + $0x20] sm:$0xff]   ;;  %v1686_v1 = vmov 0.0   ;;  %v1618_v3 = vld [vmem:[%s1985_s1 + $0x28] sm:$0xff]   ;;  %vm1687_vm0 = vmmov 0   ;;  %v45_v5 = vlaneseq  ;;  %v1620_v6 = vld [vmem:[%s1985_s1 + $0x30] sm:$0xff]   ;;  %vm103_vm2 = vcmask 523264  }
  0x10   :  { %1468 = vmatprep.subr.bf16.mxu0 %v1686_v1  ;;  %1480 = vmatprep.subr.bf16.mxu1 %v1686_v1  ;;  %v1617_v2 = vld [vmem:[%s1985_s1] sm:$0xff]   ;;  %v1619_v4 = vld [vmem:[%s1985_s1 + $0x8] sm:$0xff]   ;;  %v1621_v7 = vld [vmem:[%s1985_s1 + $0x10] sm:$0xff]   ;;  %vm286_vm4 = vcmask 130048   ;;  %s1688_s10 = smov 0.0   ;;  %s1407_s13 = sld [smem:[#allocation2 + $0x1]] }
  0x11   :  { %1469 = vmatpush3.bf16.msra.mxu0 %v1616_v0  ;;  %1476 = vmatprep.mubr.msk.bf16.mxu0 %vm1687_vm0, %v1686_v1  ;;  %v35_v8 = vld [vmem:[%s1984_s0] sm:$0xff]  ;;  %v1389_v9 = vld [vmem:[%s1984_s0 + $0x8] sm:$0xff]  ;;  %v1390_v10 = vld [vmem:[%s1984_s0 + $0x10] sm:$0xff]  ;;  %v46_v13 = vshrl.u32 %v45_v5, 7  ;;  %vm389_vm5 = vcmask 64512   ;;  %s1689_s18 = smov 80  }
  0x12   :  { %1481 = vmatpush3.bf16.msra.mxu1 %v1617_v2  ;;  %1470 = vmatprep.subr.bf16.mxu0 %v1686_v1  ;;  %v38_v11 = vmax.f32 %v35_v8, %v1389_v9  ;;  %v1391_v12 = vld [vmem:[%s1984_s0 + $0x18] sm:$0xff]  ;;  %v1624_v20 = vld [vmem:[%s1985_s1 + $0x40] sm:$0xff]   ;;  %v1625_v23 = vld [vmem:[%s1985_s1 + $0x48] sm:$0xff]   ;;  %s1690_s19 = smov 112   ;;  %s1691_s20 = smov 96   ;;  %vm1362_vm6 = vcmask 261120  }
  0x13   :  { %1482 = vmatprep.subr.bf16.mxu1 %v1686_v1  ;;  %1488 = vmatprep.mubr.msk.bf16.mxu1 %vm1687_vm0, %v1686_v1  ;;  %v1622_v14 = vld [vmem:[%s1985_s1 + $0x38] sm:$0xff]   ;;  %v43_v15 = vmax.f32 %v1390_v10, %v1391_v12  ;;  %vm47_vm1 = vcmp.eq.s32.totalorder %v46_v13, 0  ;;  %v1626_v24 = vld [vmem:[%s1985_s1 + $0x50] sm:$0xff]   ;;  %vm50_vm3 = vcmp.eq.s32.totalorder %v46_v13, 7  ;;  %v1628_v62 = vld [vmem:[%s1986_s2] sm:$0xff]   ;;  %s1408_s2 = sld [smem:[#allocation2 + $0x2]] }
  0x14   :  { %v1623_v16 = vld [vmem:[%s1985_s1 + $0x18] sm:$0xff]   ;;  %s1692_s25 = smov 64   ;;  %s1693_s26 = smov 48   ;;  %vm1364_vm7 = vcmask 392192   ;;  %vm1367_vm8 = vcmask 654336   ;;  %vm1369_vm9 = vcmask 785408  }
  0x15   :  { %1471 = vmatpush3.bf16.msra.mxu0 %v1618_v3  ;;  %v44_v17 = vmax.f32 %v38_v11, %v43_v15  ;;  %v1627_v26 = vld [vmem:[%s1985_s1 + $0x58] sm:$0xff]   ;;  %s283_s1 = sld [smem:[#allocation2]]  ;;  %v381_v11 = vld [vmem:[%s1987_s3] sm:$0xff]  ;;  %v382_v15 = vld [vmem:[%s1987_s3 + $0x8] sm:$0xff]  ;;  %s1412_s17 = sld [smem:[#allocation2 + $0x3]]  ;;  %vm1371_vm10 = vcmask 916480  }
  0x16   :  { %1483 = vmatpush3.bf16.msra.mxu1 %v1619_v4  ;;  %1472 = vmatprep.subr.bf16.mxu0 %v1686_v1 }
  0x17   :  { %1484 = vmatprep.subr.bf16.mxu1 %v1686_v1  ;;  %v78_v18 = vpack.c.bf16 %v44_v17, %v44_v17  ;;  %v48_v19 = vrot.slane %v44_v17, 7  ;;  %v51_v25 = vrot.slane %v44_v17, 1 }
  0x19   :  { %1473 = vmatpush3.bf16.msra.mxu0 %v1620_v6  ;;  %v49_v21 = vsel %vm47_vm1, 0.0, %v48_v19  ;;  %v52_v27 = vsel %vm50_vm3, 0.0, %v51_v25  ;;  %v326_v5 = vstv %s1408_s2  ;;  %v384_v19 = vld [vmem:[%s1987_s3 + $0x18] sm:$0xff] }
  0x1a   :  { %1485 = vmatpush3.bf16.msra.mxu1 %v1621_v7  ;;  %1474 = vmatprep.subr.bf16.mxu0 %v1686_v1  ;;  %v77_v22 = vpack.c.bf16 %v49_v21, %v49_v21  ;;  %v214_v28 = vpack.c.bf16 %v52_v27, %v52_v27 }
  0x1b   :  { %1486 = vmatprep.subr.bf16.mxu1 %v1686_v1  ;;  %v284_v39 = vstv %s283_s1  ;;  %s1694_s1 = smov 32  }
  0x1d   :  { %1475 = vmatpush3.bf16.msra.mxu0 %v1622_v14 }
  0x1e   :  { %1487 = vmatpush3.bf16.msra.mxu1 %v1623_v16  ;;  %1492 = vmatprep.subr.bf16.mxu0 %v1686_v1 }
  0x1f   :  { %1504 = vmatprep.subr.bf16.mxu1 %v1686_v1 }
  0x20   :  { %1477 = vmatmul.mubr.msk.bf16.vlgmr.msra.gmra.mrb[0].mxu0 %vm103_vm2, %v78_v18  ;;  %v383_v18 = vld [vmem:[%s1987_s3 + $0x10] sm:$0xff] }
  0x21   :  { %1493 = vmatpush3.bf16.msra.mxu0 %v1624_v20  ;;  %1500 = vmatprep.mubr.msk.bf16.mxu0 %vm1687_vm0, %v1686_v1 }
  0x22   :  { %1489 = vmatmul.mubr.msk.bf16.vlgmr.msra.gmra.mrb[0].mxu1 %vm103_vm2, %v77_v22  ;;  %1494 = vmatprep.subr.bf16.mxu0 %v1686_v1 }
  0x23   :  { %1506 = vmatprep.mubr.msk.bf16.mxu1 %vm1687_vm0, %v1686_v1  ;;  %1505 = vmatpush3.bf16.msra.mxu1 %v1628_v62 }
  0x24   :  { %1510 = vmatprep.subr.mxu1 %v1686_v1 }
  0x25   :  { %1495 = vmatpush3.bf16.msra.mxu0 %v1625_v23 }
  0x26   :  { %1496 = vmatprep.subr.bf16.mxu0 %v1686_v1 }
  0x29   :  { %1497 = vmatpush3.bf16.msra.mxu0 %v1626_v24 }
  0x2a   :  { %1498 = vmatprep.subr.bf16.mxu0 %v1686_v1 }
  0x2d   :  { %1499 = vmatpush3.bf16.msra.mxu0 %v1627_v26 }
  0x2e   :  { %1520 = vmatprep.subr.mxu0 %v1686_v1 }
  0x30   :  { %1501 = vmatmul.mubr.msk.bf16.vlgmr.msra.gmra.mrb[4].mxu0 %vm103_vm2, %v214_v28 }
  0x31   :  { %1522 = vmatprep.mubr.msk.f32.mxu0 %vm1687_vm0, %v1686_v1 }
  0xf3   :  { %v141_v29 = vpop.f32.mrb[0].mxu0 }
  0xf4   :  { %v1478_v30 = vpop.f32.mrb[1].mxu0 }
  0xf5   :  { %v208_v31 = vpop.f32.mrb[0].mxu1  ;;  %v144_v32 = vpop.f32.mrb[2].mxu0 }
  0xf6   :  { %v209_v33 = vadd.f32 %v208_v31, %v141_v29  ;;  %v1479_v34 = vpop.f32.mrb[3].mxu0  ;;  %v1490_v35 = vpop.f32.mrb[1].mxu1 }
  0xf7   :  { %v211_v36 = vpop.f32.mrb[2].mxu1 }
  0xf8   :  { %v1491_v37 = vpop.f32.mrb[3].mxu1 }
 0x103   :  { %v276_v38 = vpop.f32.mrb[4].mxu0 }
 0x104   :  { %v282_v40 = vadd.f32 %v276_v38, %v209_v33  ;;  %v1502_v41 = vpop.f32.mrb[5].mxu0 }
 0x105   :  { %v279_v42 = vpop.f32.mrb[6].mxu0 }
 0x106   :  { %v285_v43 = vadd.f32 %v284_v39, %v282_v40  ;;  %v1503_v44 = vpop.f32.mrb[7].mxu0  ;;  %v385_v42 = vld [vmem:[%s1987_s3 + $0x20] sm:$0xff] }
 0x108   :  { %v287_v45 = vsel %vm286_vm4, %v285_v43, 0.0  ;;  %v298_v46 = vmul.f32 %v285_v43, %v285_v43 }
 0x109   :  { %288 = vadd.xlane.f32.xlu0 %v287_v45 }
 0x10a   :  { %v299_v47 = vsel %vm286_vm4, %v298_v46, 0.0 }
 0x10d   :  { %300 = vadd.xlane.f32.xlu0 %v299_v47 }
 0x196   :  { %v289_v48 = vpop.xlane.xlu0 %288 }
 0x197   :  { %v290_v49 = vrot.slane %v289_v48, 4 }
 0x199   :  { %v291_v50 = vadd.f32 %v290_v49, %v289_v48 }
 0x19a   :  { %v301_v51 = vpop.xlane.xlu0 %300 }
 0x19b   :  { %v292_v52 = vrot.slane %v291_v50, 2  ;;  %v302_v53 = vrot.slane %v301_v51, 4 }
 0x19d   :  { %v303_v54 = vadd.f32 %v302_v53, %v301_v51  ;;  %v293_v55 = vadd.f32 %v292_v52, %v291_v50 }
 0x19f   :  { %v304_v56 = vrot.slane %v303_v54, 2  ;;  %v294_v57 = vrot.slane %v293_v55, 1 }
 0x1a1   :  { %v295_v58 = vadd.f32 %v294_v57, %v293_v55  ;;  %v305_v59 = vadd.f32 %v304_v56, %v303_v54 }
 0x1a3   :  { %1550 = vpush %v295_v58  ;;  %v306_v60 = vrot.slane %v305_v59, 1 }
 0x1a5   :  { %v307_v61 = vadd.f32 %v306_v60, %v305_v59 }
 0x1a7   :  { %1552 = vpush %v307_v61 }
 0x1d4   :  { %s1551_s29 = spop %1550 }
 0x1d5   :  { %s297_s30 = smul.f32 0.0078125, %s1551_s29  ;;  %s1695_s29 = smov 16  }
 0x1d7   :  { %s310_s6 = smul.f32 %s297_s30, %s297_s30  ;;  %v322_v2 = vstv %s297_s30 }
 0x1d8   :  { %s1553_s7 = spop %1552  ;;  %v323_v3 = vsub.f32 %v285_v43, %v322_v2 }
 0x1d9   :  { %s309_s8 = smul.f32 0.0078125, %s1553_s7 }
 0x1db   :  { %s311_s9 = ssub.f32 %s309_s8, %s310_s6 }
 0x1dd   :  { %s312_s11 = smax.f32 %s1688_s10, %s311_s9 }
 0x1de   :  { %s315_s12 = sadd.f32 1e-05, %s312_s11 }
 0x1e0   :  { %v316_v63 = vstv %s315_s12 }
 0x1e1   :  { %1629 = vrsqrt.f32 %v316_v63 }
 0x1eb   :  { %v1630_v0 = vpop.eup %1629 }
 0x1ec   :  { %1554 = vpush %v1630_v0 }
 0x21d   :  { %s1555_s14 = spop %1554 }
 0x21e   :  { %s319_s15 = smul.f32 %s1555_s14, %s1407_s13 }
 0x220   :  { %v324_v4 = vstv %s319_s15 }
 0x221   :  { %v325_v6 = vmul.f32 %v324_v4, %v323_v3  ;;  %v386_v3 = vld [vmem:[%s1987_s3 + $0x28] sm:$0xff] }
 0x223   :  { %v327_v7 = vadd.f32 %v326_v5, %v325_v6 }
 0x225   :  { %v328_v8 = vmax.f32 %v327_v7, 0.0 }
 0x227   :  { %v329_v9 = vpack.c.bf16 %v328_v8, %v328_v8 }
 0x229   :  { %1507 = vmatmul.mubr.msk.bf16.vlgmr.msra.gmra.mrb[4].mxu1 %vm286_vm4, %v329_v9 }
 0x22a   :  { %1512 = vmatprep.mubr.msk.f32.mxu1 %vm1687_vm0, %v1686_v1 }
 0x2fc   :  { %v1815_v10 = vpop.f32.mrb[4].mxu1 }
 0x2fd   :  { %743 = vrot.lane.b32.xlu0 %v1815_v10, %s1689_s18  ;;  %507 = vrot.lane.b32.xlu1 %v1815_v10, %s1690_s19  ;;  %v1508_v12 = vpop.f32.mrb[5].mxu1 }
 0x2fe   :  { %1511 = vmatpush3.msra.mxu1 %v1815_v10  ;;  %v378_v13 = vpop.f32.mrb[6].mxu1  ;;  %v387_v12 = vld [vmem:[%s1987_s3 + $0x30] sm:$0xff] }
 0x2ff   :  { %1513 = vmatmul.mubr.msk.f32.vlgmr.msra.gmra.mrb[8].mxu1 %vm389_vm5, %v381_v11  ;;  %v1509_v14 = vpop.f32.mrb[7].mxu1  ;;  %1515 = vmatprep.subr.mxu1 %v1686_v1 }
 0x300   :  { %1517 = vmatprep.mubr.msk.f32.mxu1 %vm1687_vm0, %v1686_v1 }
 0x301   :  { %625 = vrot.lane.b32.xlu1 %v1815_v10, %s1691_s20 }
 0x36f   :  { %v508_v16 = vpop.permute.xlu1 %507  ;;  %v744_v17 = vpop.permute.xlu0 %743 }
 0x370   :  { %1516 = vmatpush3.msra.mxu1 %v508_v16 }
 0x371   :  { %1518 = vmatmul.mubr.msk.f32.vlgmr.msra.gmra.mrb[10].mxu1 %vm389_vm5, %v382_v15  ;;  %1525 = vmatprep.subr.mxu1 %v1686_v1 }
 0x372   :  { %1526 = vmatpush3.msra.mxu1 %v744_v17  ;;  %1527 = vmatprep.mubr.msk.f32.mxu1 %vm1687_vm0, %v1686_v1 }
 0x373   :  { %v626_v20 = vpop.permute.xlu1 %625  ;;  %1535 = vmatprep.subr.mxu1 %v1686_v1 }
 0x374   :  { %1521 = vmatpush3.msra.mxu0 %v626_v20  ;;  %v388_v20 = vld [vmem:[%s1987_s3 + $0x38] sm:$0xff] }
 0x375   :  { %1523 = vmatmul.mubr.msk.f32.vlgmr.msra.gmra.mrb[8].mxu0 %vm389_vm5, %v383_v18  ;;  %1528 = vmatmul.mubr.msk.f32.vlgmr.msra.gmra.mrb[12].mxu1 %vm389_vm5, %v384_v19 }
 0x376   :  { %1530 = vmatprep.subr.mxu0 %v1686_v1  ;;  %1532 = vmatprep.mubr.msk.f32.mxu0 %vm1687_vm0, %v1686_v1 }
 0x377   :  { %1537 = vmatprep.mubr.msk.f32.mxu1 %vm1687_vm0, %v1686_v1 }
 0x3d2   :  { %v1852_v21 = vpop.f32.mrb[8].mxu1 }
 0x3d3   :  { %v463_v22 = vsel %vm286_vm4, %v1852_v21, 0.0  ;;  %v474_v23 = vmul.f32 %v1852_v21, %v1852_v21  ;;  %v1514_v24 = vpop.f32.mrb[9].mxu1 }
 0x3d4   :  { %464 = vadd.xlane.f32.xlu1 %v463_v22 }
 0x3d5   :  { %v475_v25 = vsel %vm286_vm4, %v474_v23, 0.0 }
 0x3d6   :  { %476 = vadd.xlane.f32.xlu0 %v475_v25 }
 0x3e5   :  { %861 = vrot.lane.b32.xlu1 %v1815_v10, %s1692_s25 }
 0x444   :  { %v1861_v26 = vpop.f32.mrb[10].mxu1 }
 0x445   :  { %v1519_v27 = vpop.f32.mrb[11].mxu1  ;;  %v583_v28 = vsel %vm286_vm4, %v1861_v26, 0.0  ;;  %v594_v29 = vmul.f32 %v1861_v26, %v1861_v26 }
 0x446   :  { %584 = vadd.xlane.f32.xlu0 %v583_v28 }
 0x447   :  { %v595_v30 = vsel %vm286_vm4, %v594_v29, 0.0 }
 0x448   :  { %v1868_v31 = vpop.f32.mrb[8].mxu0  ;;  %596 = vadd.xlane.f32.xlu1 %v595_v30  ;;  %v1870_v32 = vpop.f32.mrb[12].mxu1 }
 0x449   :  { %v712_v33 = vmul.f32 %v1868_v31, %v1868_v31  ;;  %v1524_v34 = vpop.f32.mrb[9].mxu0  ;;  %v1529_v35 = vpop.f32.mrb[13].mxu1  ;;  %v701_v53 = vsel %vm286_vm4, %v1868_v31, 0.0  ;;  %v830_v54 = vmul.f32 %v1870_v32, %v1870_v32  ;;  %v819_v55 = vsel %vm286_vm4, %v1870_v32, 0.0 }
 0x44b   :  { %v713_v36 = vsel %vm286_vm4, %v712_v33, 0.0  ;;  %v831_v56 = vsel %vm286_vm4, %v830_v54, 0.0 }
 0x44c   :  { %714 = vadd.xlane.f32.xlu1 %v713_v36 }
 0x45c   :  { %979 = vrot.lane.b32.xlu0 %v1815_v10, %s1693_s26 }
 0x45d   :  { %1097 = vrot.lane.b32.xlu1 %v1815_v10, %s1694_s1 }
 0x461   :  { %v465_v37 = vpop.xlane.xlu1 %464 }
 0x462   :  { %v466_v38 = vrot.slane %v465_v37, 4 }
 0x463   :  { %v477_v39 = vpop.xlane.xlu0 %476 }
 0x464   :  { %v467_v40 = vadd.f32 %v466_v38, %v465_v37  ;;  %v478_v41 = vrot.slane %v477_v39, 4 }
 0x465   :  { %v862_v43 = vpop.permute.xlu1 %861 }
 0x466   :  { %v468_v44 = vrot.slane %v467_v40, 2  ;;  %v479_v45 = vadd.f32 %v478_v41, %v477_v39  ;;  %1531 = vmatpush3.msra.mxu0 %v862_v43 }
 0x467   :  { %1533 = vmatmul.mubr.msk.f32.vlgmr.msra.gmra.mrb[10].mxu0 %vm389_vm5, %v385_v42  ;;  %1540 = vmatprep.subr.mxu0 %v1686_v1 }
 0x468   :  { %v480_v46 = vrot.slane %v479_v45, 2  ;;  %v469_v47 = vadd.f32 %v468_v44, %v467_v40  ;;  %1542 = vmatprep.mubr.msk.f32.mxu0 %vm1687_vm0, %v1686_v1 }
 0x46a   :  { %v470_v48 = vrot.slane %v469_v47, 1  ;;  %v481_v49 = vadd.f32 %v480_v46, %v479_v45 }
 0x46c   :  { %v471_v50 = vadd.f32 %v470_v48, %v469_v47  ;;  %v482_v51 = vrot.slane %v481_v49, 1 }
 0x46e   :  { %1556 = vpush %v471_v50  ;;  %v483_v52 = vadd.f32 %v482_v51, %v481_v49 }
 0x470   :  { %1558 = vpush %v483_v52 }
 0x47b   :  { %702 = vadd.xlane.f32.xlu0 %v701_v53 }
 0x47f   :  { %820 = vadd.xlane.f32.xlu0 %v819_v55 }
 0x481   :  { %832 = vadd.xlane.f32.xlu1 %v831_v56 }
 0x495   :  { %1215 = vrot.lane.b32.xlu0 %v1815_v10, %s1695_s29 }
 0x49f   :  { %s1557_s30 = spop %1556 }
 0x4a0   :  { %s473_s6 = smul.f32 0.0078125, %s1557_s30 }
 0x4a1   :  { %s1559_s7 = spop %1558 }
 0x4a2   :  { %s486_s8 = smul.f32 %s473_s6, %s473_s6  ;;  %v499_v57 = vstv %s473_s6 }
 0x4a3   :  { %v500_v58 = vsub.f32 %v1852_v21, %v499_v57  ;;  %s485_s9 = smul.f32 0.0078125, %s1559_s7 }
 0x4a5   :  { %s487_s11 = ssub.f32 %s485_s9, %s486_s8  ;;  %s1415_s8 = sld [smem:[#allocation2 + $0x4]] }
 0x4a7   :  { %s488_s12 = smax.f32 %s1688_s10, %s487_s11 }
 0x4a8   :  { %s492_s13 = sadd.f32 1e-05, %s488_s12 }
 0x4aa   :  { %v493_v59 = vstv %s492_s13 }
 0x4ab   :  { %1631 = vrsqrt.f32 %v493_v59 }
 0x4b5   :  { %v1632_v60 = vpop.eup %1631 }
 0x4b6   :  { %1560 = vpush %v1632_v60 }
 0x4d3   :  { %v585_v61 = vpop.xlane.xlu0 %584 }
 0x4d4   :  { %v586_v62 = vrot.slane %v585_v61, 4 }
 0x4d5   :  { %v597_v63 = vpop.xlane.xlu1 %596 }
 0x4d6   :  { %v587_v0 = vadd.f32 %v586_v62, %v585_v61  ;;  %v598_v2 = vrot.slane %v597_v63, 4 }
 0x4d7   :  { %v980_v4 = vpop.permute.xlu0 %979 }
 0x4d8   :  { %v588_v5 = vrot.slane %v587_v0, 2  ;;  %v599_v6 = vadd.f32 %v598_v2, %v597_v63  ;;  %1536 = vmatpush3.msra.mxu1 %v980_v4 }
 0x4d9   :  { %v715_v7 = vpop.xlane.xlu1 %714  ;;  %1538 = vmatmul.mubr.msk.f32.vlgmr.msra.gmra.mrb[14].mxu1 %vm389_vm5, %v386_v3  ;;  %1545 = vmatprep.subr.mxu1 %v1686_v1 }
 0x4da   :  { %v600_v8 = vrot.slane %v599_v6, 2  ;;  %v589_v9 = vadd.f32 %v588_v5, %v587_v0  ;;  %1547 = vmatprep.mubr.msk.f32.mxu1 %vm1687_vm0, %v1686_v1  ;;  %v716_v23 = vrot.slane %v715_v7, 4 }
 0x4dc   :  { %v590_v10 = vrot.slane %v589_v9, 1  ;;  %v601_v11 = vadd.f32 %v600_v8, %v599_v6  ;;  %v717_v28 = vadd.f32 %v716_v23, %v715_v7 }
 0x4dd   :  { %v1098_v13 = vpop.permute.xlu1 %1097 }
 0x4de   :  { %1541 = vmatpush3.msra.mxu0 %v1098_v13  ;;  %v591_v14 = vadd.f32 %v590_v10, %v589_v9  ;;  %v602_v15 = vrot.slane %v601_v11, 1  ;;  %v718_v30 = vrot.slane %v717_v28, 2 }
 0x4df   :  { %1543 = vmatmul.mubr.msk.f32.vlgmr.msra.gmra.mrb[12].mxu0 %vm389_vm5, %v387_v12 }
 0x4e0   :  { %1562 = vpush %v591_v14  ;;  %v603_v16 = vadd.f32 %v602_v15, %v601_v11  ;;  %v719_v35 = vadd.f32 %v718_v30, %v717_v28 }
 0x4e2   :  { %1564 = vpush %v603_v16  ;;  %v720_v37 = vrot.slane %v719_v35, 1 }
 0x4e4   :  { %v721_v40 = vadd.f32 %v720_v37, %v719_v35 }
 0x4e7   :  { %s1561_s0 = spop %1560 }
 0x4e8   :  { %s496_s21 = smul.f32 %s1561_s0, %s1412_s17 }
 0x4ea   :  { %v501_v17 = vstv %s496_s21  ;;  %s1418_s21 = sld [smem:[#allocation2 + $0x5]] }
 0x4eb   :  { %v1908_v1 = vmul.f32 %v501_v17, %v500_v58 }
 0x508   :  { %v703_v18 = vpop.xlane.xlu0 %702 }
 0x509   :  { %v704_v22 = vrot.slane %v703_v18, 4 }
 0x50b   :  { %v705_v27 = vadd.f32 %v704_v22, %v703_v18 }
 0x50c   :  { %v821_v19 = vpop.xlane.xlu0 %820 }
 0x50d   :  { %v706_v29 = vrot.slane %v705_v27, 2  ;;  %v822_v46 = vrot.slane %v821_v19, 4 }
 0x50e   :  { %v833_v45 = vpop.xlane.xlu1 %832 }
 0x50f   :  { %v707_v34 = vadd.f32 %v706_v29, %v705_v27  ;;  %v834_v48 = vrot.slane %v833_v45, 4  ;;  %v823_v52 = vadd.f32 %v822_v46, %v821_v19 }
 0x510   :  { %v1216_v21 = vpop.permute.xlu0 %1215 }
 0x511   :  { %s1563_s24 = spop %1562  ;;  %1546 = vmatpush3.msra.mxu1 %v1216_v21  ;;  %v708_v36 = vrot.slane %v707_v34, 1  ;;  %v835_v53 = vadd.f32 %v834_v48, %v833_v45  ;;  %v824_v54 = vrot.slane %v823_v52, 2 }
 0x512   :  { %s593_s4 = smul.f32 0.0078125, %s1563_s24  ;;  %1548 = vmatmul.mubr.msk.f32.vlgmr.msra.gmra.mrb[16].mxu1 %vm389_vm5, %v388_v20 }
 0x513   :  { %s1565_s27 = spop %1564  ;;  %v709_v39 = vadd.f32 %v708_v36, %v707_v34  ;;  %v836_v56 = vrot.slane %v835_v53, 2  ;;  %v825_v57 = vadd.f32 %v824_v54, %v823_v52 }
 0x514   :  { %s606_s28 = smul.f32 %s593_s4, %s593_s4  ;;  %v618_v24 = vstv %s593_s4 }
 0x515   :  { %v619_v25 = vsub.f32 %v1861_v26, %v618_v24  ;;  %s605_s30 = smul.f32 0.0078125, %s1565_s27  ;;  %v837_v58 = vadd.f32 %v836_v56, %v835_v53  ;;  %v826_v59 = vrot.slane %v825_v57, 1 }
 0x517   :  { %s607_s6 = ssub.f32 %s605_s30, %s606_s28  ;;  %v838_v60 = vrot.slane %v837_v58, 1  ;;  %v827_v62 = vadd.f32 %v826_v59, %v825_v57 }
 0x519   :  { %s608_s7 = smax.f32 %s1688_s10, %s607_s6  ;;  %v839_v63 = vadd.f32 %v838_v60, %v837_v58 }
 0x51a   :  { %s611_s3 = sadd.f32 1e-05, %s608_s7 }
 0x51c   :  { %v612_v33 = vstv %s611_s3 }
 0x51d   :  { %1633 = vrsqrt.f32 %v612_v33 }
 0x527   :  { %v1634_v38 = vpop.eup %1633 }
 0x528   :  { %1566 = vpush %v1634_v38 }
 0x529   :  { %1568 = vpush %v709_v39 }
 0x52a   :  { %1570 = vpush %v721_v40 }
 0x53a   :  { %v1916_v26 = vpop.f32.mrb[10].mxu0 }
 0x53b   :  { %v937_v41 = vsel %vm286_vm4, %v1916_v26, 0.0  ;;  %v948_v42 = vmul.f32 %v1916_v26, %v1916_v26  ;;  %v1534_v43 = vpop.f32.mrb[11].mxu0 }
 0x53c   :  { %938 = vadd.xlane.f32.xlu0 %v937_v41 }
 0x53d   :  { %v949_v44 = vsel %vm286_vm4, %v948_v42, 0.0 }
 0x53e   :  { %950 = vadd.xlane.f32.xlu1 %v949_v44 }
 0x559   :  { %s1567_s9 = spop %1566 }
 0x55a   :  { %s615_s11 = smul.f32 %s1567_s9, %s1415_s8  ;;  %s1569_s12 = spop %1568 }
 0x55b   :  { %s711_s13 = smul.f32 0.0078125, %s1569_s12  ;;  %s1571_s2 = spop %1570 }
 0x55c   :  { %v620_v47 = vstv %s615_s11  ;;  %s723_s14 = smul.f32 0.0078125, %s1571_s2  ;;  %s1421_s8 = sld [smem:[#allocation2 + $0x6]] }
 0x55d   :  { %v1923_v49 = vmul.f32 %v620_v47, %v619_v25  ;;  %s724_s15 = smul.f32 %s711_s13, %s711_s13  ;;  %v736_v50 = vstv %s711_s13  ;;  %s1416_s9 = sld [smem:[#allocation2 + $0xc]] }
 0x55e   :  { %v737_v51 = vsub.f32 %v1868_v31, %v736_v50  ;;  %s1422_s13 = sld [smem:[#allocation2 + $0xe]]  ;;  %s1419_s2 = sld [smem:[#allocation2 + $0xd]] }
 0x55f   :  { %s725_s16 = ssub.f32 %s723_s14, %s724_s15 }
 0x561   :  { %s726_s17 = smax.f32 %s1688_s10, %s725_s16 }
 0x562   :  { %s729_s0 = sadd.f32 1e-05, %s726_s17 }
 0x563   :  { %v622_v37 = vstv %s1416_s9  ;;  %s1428_s9 = sld [smem:[#allocation2 + $0x10]] }
 0x564   :  { %v730_v55 = vstv %s729_s0  ;;  %v623_v39 = vadd.f32 %v622_v37, %v1923_v49  ;;  %v858_v41 = vstv %s1422_s13  ;;  %v740_v42 = vstv %s1419_s2 }
 0x565   :  { %1635 = vrsqrt.f32 %v730_v55 }
 0x566   :  { %v624_v44 = vmax.f32 %v623_v39, 0.0 }
 0x56f   :  { %v1636_v61 = vpop.eup %1635 }
 0x570   :  { %1572 = vpush %v1636_v61 }
 0x571   :  { %1574 = vpush %v827_v62 }
 0x572   :  { %1576 = vpush %v839_v63 }
 0x5a1   :  { %s1573_s22 = spop %1572 }
 0x5a2   :  { %s733_s23 = smul.f32 %s1573_s22, %s1418_s21  ;;  %s1575_s24 = spop %1574 }
 0x5a3   :  { %s829_s4 = smul.f32 0.0078125, %s1575_s24  ;;  %s1577_s27 = spop %1576 }
 0x5a4   :  { %v738_v31 = vstv %s733_s23  ;;  %s841_s28 = smul.f32 0.0078125, %s1577_s27 }
 0x5a5   :  { %v1927_v0 = vmul.f32 %v738_v31, %v737_v51  ;;  %s842_s30 = smul.f32 %s829_s4, %s829_s4  ;;  %v854_v2 = vstv %s829_s4 }
 0x5a6   :  { %v855_v3 = vsub.f32 %v1870_v32, %v854_v2 }
 0x5a7   :  { %s843_s6 = ssub.f32 %s841_s28, %s842_s30  ;;  %v741_v45 = vadd.f32 %v740_v42, %v1927_v0 }
 0x5a9   :  { %s844_s7 = smax.f32 %s1688_s10, %s843_s6  ;;  %v742_v47 = vmax.f32 %v741_v45, 0.0 }
 0x5aa   :  { %s847_s3 = sadd.f32 1e-05, %s844_s7 }
 0x5ac   :  { %v848_v4 = vstv %s847_s3  ;;  %v1931_v5 = vpop.f32.mrb[14].mxu1 }
 0x5ad   :  { %1637 = vrsqrt.f32 %v848_v4  ;;  %v1055_v6 = vsel %vm286_vm4, %v1931_v5, 0.0  ;;  %v1539_v7 = vpop.f32.mrb[15].mxu1  ;;  %v1066_v8 = vmul.f32 %v1931_v5, %v1931_v5 }
 0x5ae   :  { %1056 = vadd.xlane.f32.xlu1 %v1055_v6 }
 0x5af   :  { %v1067_v9 = vsel %vm286_vm4, %v1066_v8, 0.0 }
 0x5b2   :  { %1068 = vadd.xlane.f32.xlu1 %v1067_v9  ;;  %v1938_v32 = vpop.f32.mrb[12].mxu0 }
 0x5b3   :  { %v1173_v10 = vsel %vm286_vm4, %v1938_v32, 0.0  ;;  %v1184_v11 = vmul.f32 %v1938_v32, %v1938_v32  ;;  %v1544_v12 = vpop.f32.mrb[13].mxu0 }
 0x5b5   :  { %v1185_v14 = vsel %vm286_vm4, %v1184_v11, 0.0 }
 0x5b6   :  { %1174 = vadd.xlane.f32.xlu1 %v1173_v10 }
 0x5b7   :  { %v1638_v13 = vpop.eup %1637 }
 0x5b8   :  { %1578 = vpush %v1638_v13 }
 0x5ba   :  { %1186 = vadd.xlane.f32.xlu1 %v1185_v14 }
 0x5c9   :  { %v939_v15 = vpop.xlane.xlu0 %938 }
 0x5ca   :  { %v940_v16 = vrot.slane %v939_v15, 4 }
 0x5cb   :  { %v951_v17 = vpop.xlane.xlu1 %950 }
 0x5cc   :  { %v941_v18 = vadd.f32 %v940_v16, %v939_v15  ;;  %v952_v19 = vrot.slane %v951_v17, 4 }
 0x5ce   :  { %v942_v20 = vrot.slane %v941_v18, 2  ;;  %v953_v21 = vadd.f32 %v952_v19, %v951_v17 }
 0x5d0   :  { %v954_v22 = vrot.slane %v953_v21, 2  ;;  %v943_v23 = vadd.f32 %v942_v20, %v941_v18 }
 0x5d2   :  { %v944_v24 = vrot.slane %v943_v23, 1  ;;  %v955_v25 = vadd.f32 %v954_v22, %v953_v21 }
 0x5d4   :  { %v945_v27 = vadd.f32 %v944_v24, %v943_v23  ;;  %v956_v28 = vrot.slane %v955_v25, 1 }
 0x5d6   :  { %1580 = vpush %v945_v27  ;;  %v957_v29 = vadd.f32 %v956_v28, %v955_v25 }
 0x5d8   :  { %1582 = vpush %v957_v29 }
 0x5e5   :  { %v1945_v30 = vpop.f32.mrb[16].mxu1 }
 0x5e6   :  { %v1291_v33 = vsel %vm286_vm4, %v1945_v30, 0.0  ;;  %v1302_v34 = vmul.f32 %v1945_v30, %v1945_v30  ;;  %v1549_v35 = vpop.f32.mrb[17].mxu1 }
 0x5e7   :  { %1292 = vadd.xlane.f32.xlu1 %v1291_v33  ;;  %v1094_v33 = vstv %s1428_s9 }
 0x5e8   :  { %v1303_v36 = vsel %vm286_vm4, %v1302_v34, 0.0 }
 0x5e9   :  { %s1579_s11 = spop %1578  ;;  %1304 = vadd.xlane.f32.xlu0 %v1303_v36 }
 0x5ea   :  { %s851_s12 = smul.f32 %s1579_s11, %s1421_s8 }
 0x5ec   :  { %v856_v38 = vstv %s851_s12 }
 0x5ed   :  { %v857_v40 = vmul.f32 %v856_v38, %v855_v3 }
 0x5ef   :  { %v859_v43 = vadd.f32 %v858_v41, %v857_v40 }
 0x5f1   :  { %v860_v46 = vmax.f32 %v859_v43, 0.0 }
 0x5f8   :  { %1334 = vrot.lane.b32.xlu1 %v624_v44, %s1695_s29 }
 0x5fc   :  { %1342 = vrot.lane.b32.xlu1 %v860_v46, %s1693_s26  ;;  %s1424_s26 = sld [smem:[#allocation2 + $0x7]] }
 0x5ff   :  { %1338 = vrot.lane.b32.xlu0 %v742_v47, %s1694_s1  ;;  %s1425_s1 = sld [smem:[#allocation2 + $0xf]] }
 0x605   :  { %v976_v2 = vstv %s1425_s1 }
 0x607   :  { %s1581_s14 = spop %1580 }
 0x608   :  { %s947_s15 = smul.f32 0.0078125, %s1581_s14 }
 0x609   :  { %s1583_s16 = spop %1582 }
 0x60a   :  { %s960_s17 = smul.f32 %s947_s15, %s947_s15  ;;  %v972_v48 = vstv %s947_s15 }
 0x60b   :  { %v973_v49 = vsub.f32 %v1916_v26, %v972_v48  ;;  %s959_s0 = smul.f32 0.0078125, %s1583_s16 }
 0x60d   :  { %s961_s21 = ssub.f32 %s959_s0, %s960_s17 }
 0x60f   :  { %s962_s22 = smax.f32 %s1688_s10, %s961_s21 }
 0x610   :  { %s965_s29 = sadd.f32 1e-05, %s962_s22  ;;  %s1430_s22 = sld [smem:[#allocation2 + $0x9]] }
 0x612   :  { %v966_v50 = vstv %s965_s29  ;;  %s1431_s29 = sld [smem:[#allocation2 + $0x11]] }
 0x613   :  { %1639 = vrsqrt.f32 %v966_v50 }
 0x61d   :  { %v1640_v51 = vpop.eup %1639 }
 0x61e   :  { %1584 = vpush %v1640_v51  ;;  %v1212_v51 = vstv %s1431_s29 }
 0x63b   :  { %v1057_v52 = vpop.xlane.xlu1 %1056 }
 0x63c   :  { %v1058_v53 = vrot.slane %v1057_v52, 4 }
 0x63e   :  { %v1059_v54 = vadd.f32 %v1058_v53, %v1057_v52 }
 0x63f   :  { %v1069_v55 = vpop.xlane.xlu1 %1068 }
 0x640   :  { %v1060_v56 = vrot.slane %v1059_v54, 2  ;;  %v1070_v57 = vrot.slane %v1069_v55, 4 }
 0x642   :  { %v1071_v58 = vadd.f32 %v1070_v57, %v1069_v55  ;;  %v1061_v59 = vadd.f32 %v1060_v56, %v1059_v54 }
 0x643   :  { %v1175_v7 = vpop.xlane.xlu1 %1174 }
 0x644   :  { %v1072_v60 = vrot.slane %v1071_v58, 2  ;;  %v1062_v61 = vrot.slane %v1061_v59, 1  ;;  %v1176_v8 = vrot.slane %v1175_v7, 4 }
 0x646   :  { %v1063_v26 = vadd.f32 %v1062_v61, %v1061_v59  ;;  %v1073_v62 = vadd.f32 %v1072_v60, %v1071_v58  ;;  %v1177_v13 = vadd.f32 %v1176_v8, %v1175_v7 }
 0x647   :  { %v1187_v9 = vpop.xlane.xlu1 %1186 }
 0x648   :  { %1586 = vpush %v1063_v26  ;;  %v1074_v63 = vrot.slane %v1073_v62, 1  ;;  %v1188_v11 = vrot.slane %v1187_v9, 4  ;;  %v1178_v15 = vrot.slane %v1177_v13, 2 }
 0x64a   :  { %v1075_v31 = vadd.f32 %v1074_v63, %v1073_v62  ;;  %v1189_v14 = vadd.f32 %v1188_v11, %v1187_v9  ;;  %v1179_v18 = vadd.f32 %v1178_v15, %v1177_v13 }
 0x64c   :  { %1588 = vpush %v1075_v31  ;;  %v1190_v16 = vrot.slane %v1189_v14, 2  ;;  %v1180_v20 = vrot.slane %v1179_v18, 1 }
 0x64e   :  { %v1191_v19 = vadd.f32 %v1190_v16, %v1189_v14  ;;  %v1181_v23 = vadd.f32 %v1180_v20, %v1179_v18 }
 0x64f   :  { %s1585_s23 = spop %1584 }
 0x650   :  { %s969_s24 = smul.f32 %s1585_s23, %s1424_s26  ;;  %v1192_v21 = vrot.slane %v1191_v19, 1 }
 0x652   :  { %v974_v0 = vstv %s969_s24 }
 0x653   :  { %v975_v3 = vmul.f32 %v974_v0, %v973_v49 }
 0x655   :  { %v977_v4 = vadd.f32 %v976_v2, %v975_v3 }
 0x657   :  { %v978_v6 = vmax.f32 %v977_v4, 0.0 }
 0x659   :  { %1346 = vrot.lane.b32.xlu1 %v978_v6, %s1692_s25  ;;  %s1427_s25 = sld [smem:[#allocation2 + $0x8]] }
 0x674   :  { %v1293_v24 = vpop.xlane.xlu1 %1292 }
 0x675   :  { %v1294_v25 = vrot.slane %v1293_v24, 4 }
 0x676   :  { %v1305_v27 = vpop.xlane.xlu0 %1304 }
 0x677   :  { %v1306_v28 = vrot.slane %v1305_v27, 4  ;;  %v1295_v37 = vadd.f32 %v1294_v25, %v1293_v24 }
 0x678   :  { %v1335_v63 = vpop.permute.xlu1 %1334 }
 0x679   :  { %s1587_s4 = spop %1586  ;;  %v1307_v39 = vadd.f32 %v1306_v28, %v1305_v27  ;;  %v1296_v41 = vrot.slane %v1295_v37, 2 }
 0x67a   :  { %s1065_s27 = smul.f32 0.0078125, %s1587_s4  ;;  %v1339_v4 = vpop.permute.xlu0 %1338 }
 0x67b   :  { %v1308_v42 = vrot.slane %v1307_v39, 2  ;;  %v1297_v44 = vadd.f32 %v1296_v41, %v1295_v37 }
 0x67c   :  { %v1090_v10 = vstv %s1065_s27  ;;  %s1078_s28 = smul.f32 %s1065_s27, %s1065_s27  ;;  %v1343_v2 = vpop.permute.xlu1 %1342 }
 0x67d   :  { %v1091_v12 = vsub.f32 %v1931_v5, %v1090_v10  ;;  %s1589_s30 = spop %1588  ;;  %v1193_v5 = vadd.f32 %v1192_v21, %v1191_v19  ;;  %v1309_v45 = vadd.f32 %v1308_v42, %v1307_v39  ;;  %v1298_v46 = vrot.slane %v1297_v44, 1 }
 0x67e   :  { %s1077_s6 = smul.f32 0.0078125, %s1589_s30 }
 0x67f   :  { %v1310_v47 = vrot.slane %v1309_v45, 1 }
 0x680   :  { %s1079_s7 = ssub.f32 %s1077_s6, %s1078_s28 }
 0x681   :  { %v1311_v49 = vadd.f32 %v1310_v47, %v1309_v45 }
 0x682   :  { %s1080_s3 = smax.f32 %s1688_s10, %s1079_s7  ;;  %s1433_s7 = sld [smem:[#allocation2 + $0xa]] }
 0x683   :  { %s1083_s8 = sadd.f32 1e-05, %s1080_s3  ;;  %s1434_s3 = sld [smem:[#allocation2 + $0x12]] }
 0x685   :  { %v1084_v17 = vstv %s1083_s8 }
 0x686   :  { %1641 = vrsqrt.f32 %v1084_v17 }
 0x689   :  { %v1330_v60 = vstv %s1434_s3 }
 0x690   :  { %v1642_v22 = vpop.eup %1641 }
 0x691   :  { %1590 = vpush %v1642_v22 }
 0x692   :  { %1592 = vpush %v1181_v23 }
 0x693   :  { %1594 = vpush %v1193_v5 }
 0x6c2   :  { %s1591_s11 = spop %1590 }
 0x6c3   :  { %s1087_s12 = smul.f32 %s1591_s11, %s1427_s25  ;;  %s1593_s13 = spop %1592 }
 0x6c4   :  { %s1183_s2 = smul.f32 0.0078125, %s1593_s13  ;;  %s1595_s14 = spop %1594 }
 0x6c5   :  { %v1092_v29 = vstv %s1087_s12  ;;  %s1195_s15 = smul.f32 0.0078125, %s1595_s14 }
 0x6c6   :  { %v1093_v34 = vmul.f32 %v1092_v29, %v1091_v12  ;;  %s1196_s16 = smul.f32 %s1183_s2, %s1183_s2  ;;  %v1208_v35 = vstv %s1183_s2 }
 0x6c7   :  { %v1209_v36 = vsub.f32 %v1938_v32, %v1208_v35  ;;  %v1299_v32 = vadd.f32 %v1298_v46, %v1297_v44 }
 0x6c8   :  { %v1095_v38 = vadd.f32 %v1094_v33, %v1093_v34  ;;  %s1197_s17 = ssub.f32 %s1195_s15, %s1196_s16 }
 0x6ca   :  { %s1198_s0 = smax.f32 %s1688_s10, %s1197_s17  ;;  %v1096_v40 = vmax.f32 %v1095_v38, 0.0 }
 0x6cb   :  { %s1201_s21 = sadd.f32 1e-05, %s1198_s0  ;;  %v1347_v6 = vpop.permute.xlu1 %1346 }
 0x6cc   :  { %1350 = vrot.lane.b32.xlu0 %v1096_v40, %s1689_s18 }
 0x6cd   :  { %v1202_v43 = vstv %s1201_s21 }
 0x6ce   :  { %1643 = vrsqrt.f32 %v1202_v43 }
 0x6d8   :  { %v1644_v48 = vpop.eup %1643 }
 0x6d9   :  { %1596 = vpush %v1644_v48 }
 0x6da   :  { %1598 = vpush %v1299_v32 }
 0x6db   :  { %1600 = vpush %v1311_v49 }
 0x70a   :  { %s1597_s26 = spop %1596 }
 0x70b   :  { %s1205_s1 = smul.f32 %s1597_s26, %s1430_s22  ;;  %s1599_s23 = spop %1598 }
 0x70c   :  { %s1301_s24 = smul.f32 0.0078125, %s1599_s23  ;;  %s1601_s18 = spop %1600 }
 0x70d   :  { %v1210_v50 = vstv %s1205_s1  ;;  %s1313_s4 = smul.f32 0.0078125, %s1601_s18 }
 0x70e   :  { %v1211_v52 = vmul.f32 %v1210_v50, %v1209_v36  ;;  %s1314_s27 = smul.f32 %s1301_s24, %s1301_s24  ;;  %v1326_v53 = vstv %s1301_s24 }
 0x70f   :  { %v1327_v54 = vsub.f32 %v1945_v30, %v1326_v53 }
 0x710   :  { %v1213_v55 = vadd.f32 %v1212_v51, %v1211_v52  ;;  %s1315_s28 = ssub.f32 %s1313_s4, %s1314_s27 }
 0x712   :  { %s1316_s30 = smax.f32 %s1688_s10, %s1315_s28  ;;  %v1214_v56 = vmax.f32 %v1213_v55, 0.0  ;;  %s1413_s10 = sld [smem:[#allocation2 + $0xb]] }
 0x713   :  { %s1319_s6 = sadd.f32 1e-05, %s1316_s30 }
 0x714   :  { %1354 = vrot.lane.b32.xlu1 %v1214_v56, %s1691_s20 }
 0x715   :  { %v1320_v57 = vstv %s1319_s6 }
 0x716   :  { %1645 = vrsqrt.f32 %v1320_v57 }
 0x718   :  { %v503_v62 = vstv %s1413_s10 }
 0x719   :  { %v504_v31 = vadd.f32 %v503_v62, %v1908_v1 }
 0x71b   :  { %v505_v0 = vmax.f32 %v504_v31, 0.0 }
 0x71d   :  { %v1361_v3 = vsel %vm286_vm4, %v505_v0, %v1335_v63 }
 0x71e   :  { %v1363_v7 = vsel %vm1362_vm6, %v1361_v3, %v1339_v4 }
 0x71f   :  { %v1365_v9 = vsel %vm1364_vm7, %v1363_v7, %v1343_v2 }
 0x720   :  { %v1646_v58 = vpop.eup %1645  ;;  %v1366_v11 = vsel %vm103_vm2, %v1365_v9, %v1347_v6 }
 0x721   :  { %1602 = vpush %v1646_v58 }
 0x73e   :  { %v1351_v8 = vpop.permute.xlu0 %1350 }
 0x73f   :  { %v1368_v1 = vsel %vm1367_vm8, %v1366_v11, %v1351_v8 }
 0x752   :  { %s1603_s8 = spop %1602 }
 0x753   :  { %s1323_s25 = smul.f32 %s1603_s8, %s1433_s7 }
 0x755   :  { %v1328_v59 = vstv %s1323_s25 }
 0x756   :  { %v1329_v61 = vmul.f32 %v1328_v59, %v1327_v54 }
 0x758   :  { %v1331_v30 = vadd.f32 %v1330_v60, %v1329_v61 }
 0x75a   :  { %v1332_v26 = vmax.f32 %v1331_v30, 0.0 }
 0x75c   :  { %1358 = vrot.lane.b32.xlu0 %v1332_v26, %s1690_s19  ;;  %s1696_s19 = smov [#allocation5]  }
 0x75d   :  { %s1380_s20 = sshll.u32 %s1696_s19, 4  ;;  %s1381_s20 = int_to_ptr.vmem [resolvable:$true] %s1380_s20 }
 0x75e   :  { %s1659_s9 = scalar_lea.vmem %s1381_s20, 128  ;;  %p1664_p6 = scmp.lt.s32.totalorder %s1381_s20, %s1381_s20 }
 0x75f   :  { %p1660_p5 = scmp.ne.s32.totalorder %s1381_s20, %s1659_s9  ;;  %p1665_p7 = scmp.lt.s32.totalorder %s1659_s9, %s1659_s9 }
 0x761   :  { %p1666_p8 = por %p1665_p7, %p1664_p6 }
 0x763   :  { %p1667_p9 = pnand %p1666_p8, %p1660_p5 }
 0x786   :  { %v1355_v10 = vpop.permute.xlu1 %1354 }
 0x787   :  { %v1370_v12 = vsel %vm1369_vm9, %v1368_v1, %v1355_v10 }
 0x7ce   :  { %v1359_v13 = vpop.permute.xlu0 %1358 }
 0x7cf   :  { %v1372_v14 = vsel %vm1371_vm10, %v1370_v12, %v1359_v13 }
 0x7d0   :  { %1373 = vst [vmem:[#allocation5] sm:$0xff] %v1372_v14 }
 0x7d1   :  { %1670 = shalt.err (!%p1667_p9)
}
 0x7d2   :  { %s1671_s13 = scalar_lea.hbm %s1989_s5, 128 }
 0x7d3   :  { %p1672_p10 = scmp.ne.s32.totalorder %s1989_s5, %s1671_s13  ;;  %p1675_p11 = scmp.lt.u32.totalorder %s1671_s13, %s1989_s5 }
 0x7d5   :  { %p1677_p12 = pnand %p1675_p11, %p1672_p10 }
 0x7d7   :  { %1680 = shalt.err (!%p1677_p12)
}
 0x7d8   :  { %1383 = dma.vmem_to_hbm [thread:$0]  %s1381_s20, 128, %s1989_s5, [#allocation3]  }
 0x7d9   :  { %1683 = dma.done.wait [#allocation3], 128  }
 0x7da   :  { %1684 = vsyncadd [#allocation3], 4294967168 }
 0x7db   :  { %1387 = vsyncpa [#allocation3], 1 }
 0x7dc   :  { %1388 = vsyncpa [#allocation4], 1 }

</bundles_post_ra>
